<compile_context>
chip_gen: v7x
topology: tpu7x:2x2x1
jax: 0.10.0
libtpu: 0.0.40
codegen_flags: <defaults>
</compile_context>

<pallas_src>
import functools

import jax
import jax.numpy as jnp
from jax.experimental import pallas as pl
from jax.experimental.pallas import tpu as pltpu

HIDDEN = 300        # logical hidden width (matches nn.Linear(..., 300))
HIDDEN_PAD = 384    # padded to a multiple of 128 (3 MXU passes on v5e, 2 on v6e/v7x)
LANE = 128


def _round_up(n, m):
    return ((n + m - 1) // m) * m


# ----------------------------------------------------------------------------
# Kernel
# ----------------------------------------------------------------------------
def actor_kernel(x_ref, w1_ref, b1_ref, w2_ref, b2_ref, w3_ref, b3_ref,
                 out_ref, *, max_action):
    # l1: one lane-dense (tm, IN_PAD) @ (IN_PAD, HIDDEN_PAD), bf16-in / f32-acc.
    h = jnp.dot(x_ref[...].astype(jnp.bfloat16), w1_ref[...],
                preferred_element_type=jnp.float32)
    h = jnp.maximum(h + b1_ref[...], 0.0)                    # bias + ReLU (VPU)
    # l2
    h = jnp.dot(h.astype(jnp.bfloat16), w2_ref[...],
                preferred_element_type=jnp.float32)
    h = jnp.maximum(h + b2_ref[...], 0.0)
    # l3 (output lanes padded to 128 -> lane-dense store)
    a = jnp.dot(h.astype(jnp.bfloat16), w3_ref[...],
                preferred_element_type=jnp.float32)
    out_ref[...] = (max_action * jnp.tanh(a + b3_ref[...])).astype(out_ref.dtype)


# ----------------------------------------------------------------------------
# Wrapper
# ----------------------------------------------------------------------------
def _pick_tm(batch):
    # Per-step FLOPs are tiny compared with the ~0.35 us fixed grid-step cost,
    # so use big batch tiles (cap 512); keep >= 2 grid steps whenever
    # batch > 128 so v7x can shard the batch axis across its two TensorCores.
    if batch <= 128:
        return _round_up(max(batch, 8), 8)
    return min(512, _round_up((batch + 1) // 2, 8))


def actor_forward(params, x, g=None, *, max_action=1.0):
    """Pallas-backed equivalent of Actor.forward."""
    x = x.astype(jnp.float32)
    xin = x if g is None else jnp.concatenate([x, g.astype(jnp.float32)], axis=1)
    B, in_dim = xin.shape

    w1, b1, w2, b2, w3, b3 = (params[k] for k in ("w1", "b1", "w2", "b2", "w3", "b3"))
    in_pad = w1.shape[0]          # input rows padded to a multiple of 128
    out_pad = w3.shape[1]         # output lanes padded to a multiple of 128
    action_dim = params["action_dim"]
    assert in_dim <= in_pad, "input wider than the padded l1 weight"

    tm = _pick_tm(B)
    n_steps = (B + tm - 1) // tm
    b_pad = n_steps * tm

    # Lane-dense, batch-padded input slab: one clean DMA + one MXU pass / step.
    # Padded lanes hit zero rows of w1; padded batch rows are sliced off below.
    x_pad = jnp.zeros((b_pad, in_pad), jnp.float32).at[:B, :in_dim].set(xin)

    def wspec(shape):
        return pl.BlockSpec(shape, lambda i: (0, 0))      # weights: VMEM-resident

    def row_spec(d):
        return pl.BlockSpec((tm, d), lambda i: (i, 0))    # batch-tiled activations

    flops = 2 * b_pad * (in_pad * HIDDEN_PAD + HIDDEN_PAD * HIDDEN_PAD
                         + HIDDEN_PAD * out_pad)
    bytes_accessed = ((w1.size + w2.size + w3.size) * 2         # bf16 weights
                      + (b1.size + b2.size + b3.size) * 4       # f32 biases
                      + x_pad.size * 4
                      + b_pad * out_pad * 4)
    cost = pl.CostEstimate(flops=flops, transcendentals=b_pad * out_pad,
                           bytes_accessed=bytes_accessed)

    out = pl.pallas_call(
        functools.partial(actor_kernel, max_action=float(max_action)),
        out_shape=jax.ShapeDtypeStruct((b_pad, out_pad), jnp.float32),
        grid_spec=pltpu.PrefetchScalarGridSpec(
            num_scalar_prefetch=0,
            grid=(n_steps,),
            in_specs=[row_spec(in_pad),
                      wspec(w1.shape), wspec(b1.shape),
                      wspec(w2.shape), wspec(b2.shape),
                      wspec(w3.shape), wspec(b3.shape)],
            out_specs=row_spec(out_pad),
        ),
        compiler_params=pltpu.CompilerParams(dimension_semantics=("parallel",)),
        cost_estimate=cost,
    )(x_pad, w1, b1, w2, b2, w3, b3)

    return out[:B, :action_dim]


# ----------------------------------------------------------------------------
# Params (nn.Linear-style init, zero-padded on all tiled axes, bf16 weights)
# ----------------------------------------------------------------------------
def init_actor_params(key, state_dim, goal_dim, action_dim):
    """Weights stored transposed ([in, out]) relative to PyTorch and zero-padded:
    l1 input rows -> multiple of 128, hidden axes -> 384, l3 output lanes ->
    multiple of 128.  Exact: padded rows/columns/biases are zero, so they
    contribute nothing and the padded output lanes are sliced off."""
    in_dim = state_dim + goal_dim
    in_pad = _round_up(in_dim, LANE)
    out_pad = _round_up(action_dim, LANE)
    keys = jax.random.split(key, 6)

    def linear(kw, kb, fan_in, fan_out, pad_in, pad_out):
        bound = 1.0 / (fan_in ** 0.5)
        w = jax.random.uniform(kw, (fan_in, fan_out), jnp.float32, -bound, bound)
        b = jax.random.uniform(kb, (1, fan_out), jnp.float32, -bound, bound)
        w_pad = jnp.zeros((pad_in, pad_out), jnp.float32).at[:fan_in, :fan_out].set(w)
        b_pad = jnp.zeros((1, pad_out), jnp.float32).at[:, :fan_out].set(b)
        return w_pad.astype(jnp.bfloat16), b_pad           # bf16 weights, f32 biases

    w1, b1 = linear(keys[0], keys[1], in_dim, HIDDEN, in_pad, HIDDEN_PAD)
    w2, b2 = linear(keys[2], keys[3], HIDDEN, HIDDEN, HIDDEN_PAD, HIDDEN_PAD)
    w3, b3 = linear(keys[4], keys[5], HIDDEN, action_dim, HIDDEN_PAD, out_pad)
    return {"w1": w1, "b1": b1, "w2": w2, "b2": b2, "w3": w3, "b3": b3,
            "action_dim": action_dim}


def actor_ref(params, x, g=None, *, max_action=1.0):
    """Pure-JAX f32 reference (same bf16-rounded weights, f32 activations)."""
    xin = x if g is None else jnp.concatenate([x, g], axis=1)
    in_pad = params["w1"].shape[0]
    xin = jnp.zeros((xin.shape[0], in_pad), jnp.float32).at[:, :xin.shape[1]].set(xin)
    w1 = params["w1"].astype(jnp.float32)
    w2 = params["w2"].astype(jnp.float32)
    w3 = params["w3"].astype(jnp.float32)
    h = jnp.maximum(xin @ w1 + params["b1"], 0.0)
    h = jnp.maximum(h @ w2 + params["b2"], 0.0)
    out = max_action * jnp.tanh(h @ w3 + params["b3"])
    return out[:, :params["action_dim"]]


# ----------------------------------------------------------------------------
if __name__ == "__main__":
    state_dim, goal_dim, action_dim = 16, 4, 4
    max_action = 2.0
    batch = 256  # tm=128 -> grid of 2 batch blocks (exercises pipelining / TC split)

    key = jax.random.PRNGKey(0)
    kp, kx, kg = jax.random.split(key, 3)

    params = init_actor_params(kp, state_dim, goal_dim, action_dim)
    x = jax.random.normal(kx, (batch, state_dim), jnp.float32)
    g = jax.random.normal(kg, (batch, goal_dim), jnp.float32)

    act = actor_forward(params, x, g, max_action=max_action)
    jax.block_until_ready(act)

    act_ref = actor_ref(params, x, g, max_action=max_action)
    assert act.shape == (batch, action_dim)
    # bf16 activations inside the kernel vs f32 reference -> loosened tolerance.
    assert jnp.allclose(act, act_ref, atol=2e-2, rtol=2e-2)

    # g=None path (x already carries the full l1 input width).
    xg = jnp.concatenate([x, g], axis=1)
    act2 = actor_forward(params, xg, None, max_action=max_action)
    jax.block_until_ready(act2)
    assert jnp.allclose(act2, act_ref, atol=2e-2, rtol=2e-2)

    # Ragged batch: exercises ceil-div grid construction + zero-row padding.
    act3 = actor_forward(params, x[:37], g[:37], max_action=max_action)
    jax.block_until_ready(act3)
    assert act3.shape == (37, action_dim)
    assert jnp.allclose(act3, act_ref[:37], atol=2e-2, rtol=2e-2)

    print("KERNEL_OK")
</pallas_src>

<mosaic_0001>
module attributes {stable_mosaic.version = 11 : i64} {
  func.func @actor_kernel(%arg0: i32, %arg1: memref<128x128xf32, #tpu.memory_space<vmem>>, %arg2: memref<128x384xbf16, #tpu.memory_space<vmem>>, %arg3: memref<1x384xf32, #tpu.memory_space<vmem>>, %arg4: memref<384x384xbf16, #tpu.memory_space<vmem>>, %arg5: memref<1x384xf32, #tpu.memory_space<vmem>>, %arg6: memref<384x128xbf16, #tpu.memory_space<vmem>>, %arg7: memref<1x128xf32, #tpu.memory_space<vmem>>, %arg8: memref<128x128xf32, #tpu.memory_space<vmem>>) attributes {dimension_semantics = [#tpu.dimension_semantics<parallel>], iteration_bounds = array<i64: 2>, scalar_prefetch = 0 : i64, scratch_operands = 0 : i64, tpu.core_type = #tpu.core_type<tc>, window_params = [{transform_indices = @transform_0, window_bounds = array<i64: 128, 128>}, {pipeline_mode = #tpu.pipeline_mode<synchronous>, transform_indices = @transform_1, window_bounds = array<i64: 128, 384>}, {pipeline_mode = #tpu.pipeline_mode<synchronous>, transform_indices = @transform_2, window_bounds = array<i64: 1, 384>}, {pipeline_mode = #tpu.pipeline_mode<synchronous>, transform_indices = @transform_3, window_bounds = array<i64: 384, 384>}, {pipeline_mode = #tpu.pipeline_mode<synchronous>, transform_indices = @transform_4, window_bounds = array<i64: 1, 384>}, {pipeline_mode = #tpu.pipeline_mode<synchronous>, transform_indices = @transform_5, window_bounds = array<i64: 384, 128>}, {pipeline_mode = #tpu.pipeline_mode<synchronous>, transform_indices = @transform_6, window_bounds = array<i64: 1, 128>}, {transform_indices = @transform_7, window_bounds = array<i64: 128, 128>}]} {
    %c0 = arith.constant 0 : index
    %c0_0 = arith.constant 0 : index
    %0 = vector.load %arg1[%c0, %c0_0] : memref<128x128xf32, #tpu.memory_space<vmem>>, vector<128x128xf32>
    %1 = arith.truncf %0 : vector<128x128xf32> to vector<128x128xbf16>
    %c0_1 = arith.constant 0 : index
    %c0_2 = arith.constant 0 : index
    %2 = vector.load %arg2[%c0_1, %c0_2] : memref<128x384xbf16, #tpu.memory_space<vmem>>, vector<128x384xbf16>
    %cst = arith.constant dense<0.000000e+00> : vector<128x384xf32>
    %3 = tpu.matmul %1, %2, %cst {dimension_numbers = #tpu.dot_dimension_numbers<[1], [0], [0], [1], [0, 0, 1, 1], [], []>} : vector<128x128xbf16>, vector<128x384xbf16>, vector<128x384xf32> -> vector<128x384xf32>
    %c0_3 = arith.constant 0 : index
    %c0_4 = arith.constant 0 : index
    %4 = vector.load %arg3[%c0_3, %c0_4] : memref<1x384xf32, #tpu.memory_space<vmem>>, vector<1x384xf32>
    %5 = vector.broadcast %4 : vector<1x384xf32> to vector<128x384xf32>
    %6 = arith.addf %3, %5 : vector<128x384xf32>
    %cst_5 = arith.constant 0.000000e+00 : f32
    %7 = vector.broadcast %cst_5 : f32 to vector<128x384xf32>
    %8 = arith.maximumf %6, %7 : vector<128x384xf32>
    %9 = arith.truncf %8 : vector<128x384xf32> to vector<128x384xbf16>
    %c0_6 = arith.constant 0 : index
    %c0_7 = arith.constant 0 : index
    %10 = vector.load %arg4[%c0_6, %c0_7] : memref<384x384xbf16, #tpu.memory_space<vmem>>, vector<384x384xbf16>
    %cst_8 = arith.constant dense<0.000000e+00> : vector<128x384xf32>
    %11 = tpu.matmul %9, %10, %cst_8 {dimension_numbers = #tpu.dot_dimension_numbers<[1], [0], [0], [1], [0, 0, 1, 1], [], []>} : vector<128x384xbf16>, vector<384x384xbf16>, vector<128x384xf32> -> vector<128x384xf32>
    %c0_9 = arith.constant 0 : index
    %c0_10 = arith.constant 0 : index
    %12 = vector.load %arg5[%c0_9, %c0_10] : memref<1x384xf32, #tpu.memory_space<vmem>>, vector<1x384xf32>
    %13 = vector.broadcast %12 : vector<1x384xf32> to vector<128x384xf32>
    %14 = arith.addf %11, %13 : vector<128x384xf32>
    %cst_11 = arith.constant 0.000000e+00 : f32
    %15 = vector.broadcast %cst_11 : f32 to vector<128x384xf32>
    %16 = arith.maximumf %14, %15 : vector<128x384xf32>
    %17 = arith.truncf %16 : vector<128x384xf32> to vector<128x384xbf16>
    %c0_12 = arith.constant 0 : index
    %c0_13 = arith.constant 0 : index
    %18 = vector.load %arg6[%c0_12, %c0_13] : memref<384x128xbf16, #tpu.memory_space<vmem>>, vector<384x128xbf16>
    %cst_14 = arith.constant dense<0.000000e+00> : vector<128x128xf32>
    %19 = tpu.matmul %17, %18, %cst_14 {dimension_numbers = #tpu.dot_dimension_numbers<[1], [0], [0], [1], [0, 0, 1, 1], [], []>} : vector<128x384xbf16>, vector<384x128xbf16>, vector<128x128xf32> -> vector<128x128xf32>
    %c0_15 = arith.constant 0 : index
    %c0_16 = arith.constant 0 : index
    %20 = vector.load %arg7[%c0_15, %c0_16] : memref<1x128xf32, #tpu.memory_space<vmem>>, vector<1x128xf32>
    %21 = vector.broadcast %20 : vector<1x128xf32> to vector<128x128xf32>
    %22 = arith.addf %19, %21 : vector<128x128xf32>
    %23 = math.tanh %22 : vector<128x128xf32>
    %cst_17 = arith.constant 2.000000e+00 : f32
    %24 = vector.broadcast %cst_17 : f32 to vector<128x128xf32>
    %25 = arith.mulf %24, %23 : vector<128x128xf32>
    %c0_18 = arith.constant 0 : index
    %c0_19 = arith.constant 0 : index
    %26 = vector.load %arg8[%c0_18, %c0_19] : memref<128x128xf32, #tpu.memory_space<vmem>>, vector<128x128xf32>
    tpu.vector_store %arg8[%c0_18, %c0_19], %25 {strides = array<i32>} : memref<128x128xf32, #tpu.memory_space<vmem>>, vector<128x128xf32>,
    return
  }
  func.func @transform_0(%arg0: i32) -> (i32, i32) {
    %c0_i32 = arith.constant 0 : i32
    %c0_i32_0 = arith.constant 0 : i32
    return %arg0, %c0_i32 : i32, i32
  }
  func.func @transform_1(%arg0: i32) -> (i32, i32) {
    %c0_i32 = arith.constant 0 : i32
    %c0_i32_0 = arith.constant 0 : i32
    %c0_i32_1 = arith.constant 0 : i32
    return %c0_i32, %c0_i32_0 : i32, i32
  }
  func.func @transform_2(%arg0: i32) -> (i32, i32) {
    %c0_i32 = arith.constant 0 : i32
    %c0_i32_0 = arith.constant 0 : i32
    %c0_i32_1 = arith.constant 0 : i32
    return %c0_i32, %c0_i32_0 : i32, i32
  }
  func.func @transform_3(%arg0: i32) -> (i32, i32) {
    %c0_i32 = arith.constant 0 : i32
    %c0_i32_0 = arith.constant 0 : i32
    %c0_i32_1 = arith.constant 0 : i32
    return %c0_i32, %c0_i32_0 : i32, i32
  }
  func.func @transform_4(%arg0: i32) -> (i32, i32) {
    %c0_i32 = arith.constant 0 : i32
    %c0_i32_0 = arith.constant 0 : i32
    %c0_i32_1 = arith.constant 0 : i32
    return %c0_i32, %c0_i32_0 : i32, i32
  }
  func.func @transform_5(%arg0: i32) -> (i32, i32) {
    %c0_i32 = arith.constant 0 : i32
    %c0_i32_0 = arith.constant 0 : i32
    %c0_i32_1 = arith.constant 0 : i32
    return %c0_i32, %c0_i32_0 : i32, i32
  }
  func.func @transform_6(%arg0: i32) -> (i32, i32) {
    %c0_i32 = arith.constant 0 : i32
    %c0_i32_0 = arith.constant 0 : i32
    %c0_i32_1 = arith.constant 0 : i32
    return %c0_i32, %c0_i32_0 : i32, i32
  }
  func.func @transform_7(%arg0: i32) -> (i32, i32) {
    %c0_i32 = arith.constant 0 : i32
    %c0_i32_0 = arith.constant 0 : i32
    return %arg0, %c0_i32 : i32, i32
  }
}

</mosaic_0001>

<bundles_post_ra>
// kernel: tpu_custom_call.1
= control target key start
LH: loop header
LB: loop body
LE: loop exit
PB: predicated region body
PF: predicated region fallthrough
CT: control target
= control target key end

     0   :  { %12 = vsyncpa [#allocation3], 0  ;;  %s3981_s0 = inlined_call_operand.hbm [shape: f32[256,128], index: 0, kind: input, shape index: {}]   ;;  %s3982_s1 = inlined_call_operand.hbm [shape: bf16[128,384], index: 1, kind: input, shape index: {}]   ;;  %s3983_s2 = inlined_call_operand.vmem [shape: f32[1,384], index: 2, kind: input, shape index: {}]   ;;  %s3984_s3 = inlined_call_operand.hbm [shape: bf16[384,384], index: 3, kind: input, shape index: {}]   ;;  %s3985_s4 = inlined_call_operand.vmem [shape: f32[1,384], index: 4, kind: input, shape index: {}]   ;;  %s3986_s5 = inlined_call_operand.hbm [shape: bf16[384,128], index: 5, kind: input, shape index: {}]   ;;  %s3987_s6 = inlined_call_operand.vmem [shape: f32[1,128], index: 6, kind: input, shape index: {}]   ;;  %s3988_s7 = inlined_call_operand.hbm [shape: f32[256,128], index: 7, kind: output, shape index: {}]  }
   0x1   :  { %14 = vsyncpa [#allocation3 + $0x1], 0 }
   0x2   :  { %15 = vsyncpa [#allocation6], 0 }
   0x3   :  { %16 = vsyncpa [#allocation9], 0 }
   0x4   :  { %17 = vsyncpa [#allocation4], 0 }
   0x5   :  { %19 = vsyncpa [#allocation4 + $0x1], 0  ;;  %s3382_s24 = smov 0   ;;  %s3384_s25 = smov 0  }
   0x6   :  { %s3386_s26 = smov 0   ;;  %s3388_s27 = smov 0  }
   0x7 LB: > { %s3403_s28 = sadd.s32 4294967295, %s3326_s27   ;;  %s2373_s29 = sadd.s32 4294967294, %s3326_s27   ;;  %s3326_s27 = sphi %s3388_s27, %s4014_s27   ;;  %s3322_s26 = sphi %s3386_s26, %s4013_s26   ;;  %s3318_s25 = sphi %s3384_s25, %s4012_s25   ;;  %s3314_s24 = sphi %s3382_s24, %s4011_s24  }
   0x8   : > { %p45_p0 = scmp.ne.s32.totalorder %s3318_s25, %s3314_s24  ;;  %p3989_p1 = scmp.eq.s32.totalorder %s3403_s28, 0 }
   0x9   : > { %p201_p3 = scmp.eq.s32.totalorder %s2373_s29, 1  ;;  %p2374_p5 = scmp.ge.s32.totalorder %s3326_s27, 1 }
   0xa   : > { %p3412_p4 = por %p3989_p1, %p45_p0  ;;  %p208_p7 = scmp.lt.s32.totalorder %s3326_s27, 3 }
   0xb   : > { %p3417_p6 = por %p201_p3, %p45_p0  ;;  %s3328_s10 = smov [#allocation5]  }
   0xc   : > { %s3993_s30 = scalar_select %p3412_p4, 1, 0 }
   0xd   : > { %s3994_s8 = scalar_select %p3417_p6, 1, 0 }
   0xe   : > { %p3422_p8 = pnand %p2374_p5, %p208_p7  ;;  %s220_s11 = sshll.u32 %s3328_s10, 4  ;;  %s3426_s11 = int_to_ptr.vmem [resolvable:$true] %s220_s11 }
   0xf   : > { %3995 = sst [smem:[#allocation15_spill]] %s3994_s8  ;;  %s3329_s13 = smov [#allocation7]  }
  0x10   : > { %s3996_s9 = scalar_select %p3422_p8, 1, 0 }
  0x11   : > { %p2884_p9 = pneg %p3422_p8  ;;  %s236_s14 = sshll.u32 %s3329_s13, 4  ;;  %s3437_s14 = int_to_ptr.vmem [resolvable:$true] %s236_s14 }
  0x12   : > { %s3330_s15 = smov [#allocation8]   ;;  %s3138_s19 = scalar_lea.hbm %s3982_s1, 3072 }
  0x13   : > { %p3433_p11 = pnand %p2884_p9, %p3989_p1  ;;  %s3439_s16 = sshll.u32 %s3330_s15, 4  ;;  %s253_s16 = int_to_ptr.vmem [resolvable:$true] %s3439_s16 }
  0x14   : > { %p3139_p12 = scmp.ne.s32.totalorder %s3982_s1, %s3138_s19  ;;  %p3145_p5 = scmp.lt.u32.totalorder %s3138_s19, %s3982_s1 }
  0x15   : > { %p3449_p13 = pneg %p3433_p11 }
  0x17   : > { %p3141_p0 = pnand %p3449_p13, %p3139_p12 }
  0x19   : > { %p3142_p3 = pneg %p3141_p0 }
  0x1b   : > { %p3147_p7 = pnand %p3145_p5, %p3142_p3 }
  0x1d   : > { %3150 = shalt.err (!%p3147_p7)
}
  0x1e   : > { %s3151_s10 = scalar_lea.vmem %s3426_s11, 3072  ;;  %p3159_p2 = scmp.lt.s32.totalorder %s3426_s11, %s3426_s11 }
  0x1f   : > { %p3152_p9 = scmp.ne.s32.totalorder %s3426_s11, %s3151_s10  ;;  %p3160_p6 = scmp.lt.s32.totalorder %s3151_s10, %s3151_s10 }
  0x21   : > { %p3154_p10 = pnand %p3152_p9, %p3449_p13  ;;  %p3161_p12 = por %p3160_p6, %p3159_p2 }
  0x23   : > { %p3155_p1 = pneg %p3154_p10 }
  0x25   : > { %p3162_p0 = pnand %p3161_p12, %p3155_p1 }
  0x27   : > { %3165 = shalt.err (!%p3162_p0)
}
  0x28   : > { %s3331_s13 = smov 192   ;;  %s3332_s15 = smov 12  }
  0x29   : > { %2887 = dma.hbm_to_vmem [thread:$0]  (!%p3433_p11), %s3982_s1, 3072, %s3426_s11, [#allocation6], %s3331_s13, %s3331_s13, %s3332_s15  }
  0x2a   : > { %s3166_s21 = scalar_lea.hbm %s3984_s3, 9216 }
  0x2b   : > { %p3167_p2 = scmp.ne.s32.totalorder %s3984_s3, %s3166_s21  ;;  %p3173_p10 = scmp.lt.u32.totalorder %s3166_s21, %s3984_s3 }
  0x2d   : > { %p3169_p1 = pnand %p3167_p2, %p3449_p13 }
  0x2f   : > { %p3170_p6 = pneg %p3169_p1 }
  0x31   : > { %p3175_p3 = pnand %p3173_p10, %p3170_p6 }
  0x33   : > { %3178 = shalt.err (!%p3175_p3)
}
  0x34   : > { %s3179_s11 = scalar_lea.vmem %s3437_s14, 9216  ;;  %p3187_p12 = scmp.lt.s32.totalorder %s3437_s14, %s3437_s14 }
  0x35   : > { %p3180_p5 = scmp.ne.s32.totalorder %s3437_s14, %s3179_s11  ;;  %p3188_p0 = scmp.lt.s32.totalorder %s3179_s11, %s3179_s11 }
  0x37   : > { %p3182_p7 = pnand %p3180_p5, %p3449_p13  ;;  %p3189_p2 = por %p3188_p0, %p3187_p12 }
  0x39   : > { %p3183_p9 = pneg %p3182_p7 }
  0x3b   : > { %p3190_p1 = pnand %p3189_p2, %p3183_p9 }
  0x3d   : > { %3193 = shalt.err (!%p3190_p1)
}
  0x3e   : > { %2890 = dma.hbm_to_vmem [thread:$0]  (!%p3433_p11), %s3984_s3, 9216, %s3437_s14, [#allocation6], %s3331_s13, %s3331_s13, %s3332_s15  }
  0x3f   : > { %s3194_s20 = scalar_lea.hbm %s3986_s5, 3072 }
  0x40   : > { %p3195_p6 = scmp.ne.s32.totalorder %s3986_s5, %s3194_s20  ;;  %p3201_p5 = scmp.lt.u32.totalorder %s3194_s20, %s3986_s5 }
  0x42   : > { %p3197_p10 = pnand %p3195_p6, %p3449_p13 }
  0x44   : > { %p3198_p3 = pneg %p3197_p10 }
  0x46   : > { %p3203_p7 = pnand %p3201_p5, %p3198_p3 }
  0x48   : > { %3206 = shalt.err (!%p3203_p7)
}
  0x49   : > { %s3207_s11 = scalar_lea.vmem %s253_s16, 3072  ;;  %p3215_p2 = scmp.lt.s32.totalorder %s253_s16, %s253_s16 }
  0x4a   : > { %p3208_p9 = scmp.ne.s32.totalorder %s253_s16, %s3207_s11  ;;  %p3216_p1 = scmp.lt.s32.totalorder %s3207_s11, %s3207_s11 }
  0x4c   : > { %p3210_p12 = pnand %p3208_p9, %p3449_p13  ;;  %p3217_p4 = por %p3216_p1, %p3215_p2 }
  0x4e   : > { %p3211_p0 = pneg %p3210_p12 }
  0x50   : > { %p3218_p8 = pnand %p3217_p4, %p3211_p0 }
  0x52   : > { %3221 = shalt.err (!%p3218_p8)
}
  0x53   : > { %s3333_s14 = smov 64   ;;  %s3334_s22 = smov 4  }
  0x54   : > { %2893 = dma.hbm_to_vmem [thread:$0]  (!%p3433_p11), %s3986_s5, 3072, %s253_s16, [#allocation9], %s3333_s14, %s3333_s14, %s3334_s22  }
  0x55   : > { %s3513_s8 = sadd.s32 1, %s3326_s27   ;;  %s32_s18 = sadd.s32 1, %s3322_s26 }
  0x56   : > { %s29_s17 = ssub.s32 %s3326_s27, %s3513_s8  ;;  %p39_p8 = scmp.ne.s32.totalorder %s3322_s26, %s3318_s25 }
  0x57   : > { %p30_p4 = scmp.eq.s32.totalorder %s29_s17, 0  ;;  %p40_p13 = scmp.eq.s32.totalorder %s3326_s27, 0 }
  0x58   : > { %p2905_p6 = scmp.lt.s32.totalorder %s3326_s27, 2  ;;  %p3999_p3 = scmp.eq.s32.totalorder %s3403_s28, 1 }
  0x59   : > { %s3523_s19 = scalar_select %p30_p4, %s3322_s26, %s32_s18  }
  0x5a   : > { %p41_p10 = por %p40_p13, %p39_p8  ;;  %p3527_p5 = por %p3999_p3, %p39_p8 }
  0x5b   : > { %s269_s12 = sand.u32 1, %s3322_s26   ;;  %s2514_s21 = sshll.u32 %s3326_s27, 11 }
  0x5c   : > { %s2379_s16 = sshll.u32 %s269_s12, 7  ;;  %s3536_s10 = scalar_lea.hbm %s3981_s0, %s2514_s21 }
  0x5d   : > { %s273_s11 = scalar_lea.vmem [#allocation2], %s2379_s16  ;;  %p3538_p11 = pnand %p2905_p6, %p41_p10 }
  0x5e   : > { %s280_s14 = sshll.u32 %s273_s11, 4  ;;  %s3544_s13 = scalar_lea.sflag [#allocation3], %s269_s12  ;;  %s3542_s14 = int_to_ptr.vmem [resolvable:$true] %s280_s14 }
  0x5f   : > { %s3222_s15 = scalar_lea.hbm %s3536_s10, 2048  ;;  %p3224_p9 = pneg %p3538_p11 }
  0x60   : > { %p3223_p7 = scmp.ne.s32.totalorder %s3536_s10, %s3222_s15  ;;  %s3227_s21 = scalar_lea.hbm %s3981_s0, 4096 }
  0x61   : > { %p3228_p2 = scmp.lt.u32.totalorder %s3536_s10, %s3981_s0  ;;  %p3229_p1 = scmp.lt.u32.totalorder %s3227_s21, %s3222_s15 }
  0x62   : > { %p3225_p12 = pnand %p3224_p9, %p3223_p7  ;;  %p3231_p8 = scmp.lt.u32.totalorder %s3222_s15, %s3536_s10 }
  0x63   : > { %p3230_p4 = por %p3229_p1, %p3228_p2 }
  0x64   : > { %p3226_p0 = pneg %p3225_p12 }
  0x65   : > { %p3232_p13 = por %p3231_p8, %p3230_p4 }
  0x67   : > { %p3233_p6 = pnand %p3232_p13, %p3226_p0 }
  0x69   : > { %3236 = shalt.err (!%p3233_p6)
}
  0x6a   : > { %s3237_s12 = scalar_lea.vmem %s3542_s14, 2048  ;;  %s3335_s29 = smov [#allocation2]  }
  0x6b   : > { %p3238_p10 = scmp.ne.s32.totalorder %s3542_s14, %s3237_s12  ;;  %s3242_s11 = sshll.u32 %s3335_s29, 4  ;;  %s3243_s11 = int_to_ptr.vmem [resolvable:$false] %s3242_s11 }
  0x6c   : > { %s3244_s17 = scalar_lea.vmem %s3243_s11, 4096  ;;  %p3245_p12 = scmp.lt.s32.totalorder %s3542_s14, %s3243_s11 }
  0x6d   : > { %p3240_p3 = pnand %p3238_p10, %p3224_p9  ;;  %p3246_p2 = scmp.lt.s32.totalorder %s3244_s17, %s3237_s12 }
  0x6f   : > { %p3241_p7 = pneg %p3240_p3  ;;  %p3247_p1 = por %p3246_p2, %p3245_p12 }
  0x71   : > { %p3248_p4 = pnand %p3247_p1, %p3241_p7 }
  0x73   : > { %3251 = shalt.err (!%p3248_p4)
}
  0x74   : > { %s3336_s15 = smov 128   ;;  %s3337_s18 = smov 8  }
  0x75   : > { %2897 = dma.hbm_to_vmem [thread:$0]  (!%p3538_p11), %s3536_s10, 2048, %s3542_s14, %s3544_s13, %s3336_s15, %s3336_s15, %s3337_s18  }
  0x76   : > { %p4002_p9 = scmp.ne.s32.totalorder %s3996_s9, 0 }
  0x77   : > { %s3575_s21 = sand.u32 (!%p4002_p9), 1, %s3318_s25   ;;  %p4003_p0 = scmp.ne.s32.totalorder (!%p4002_p9), %s3993_s30, 0 }
  0x78   : > { %292 = sbr.rel (%p4002_p9) target bundleno = 993 (0x3e1), region = 48  ;;  %s2383_s16 = sshll.u32 (!%p4002_p9), %s3575_s21, 7 }
  0x79   : > { %s295_s23 = scalar_lea.sflag (!%p4002_p9), [#allocation3], %s3575_s21  ;;  %s3581_s12 = scalar_lea.vmem (!%p4002_p9), [#allocation2], %s2383_s16 }
  0x7f   : > { %3297 = dma.done.wait (%p4003_p0), %s295_s23, 2048  }
  0x80   : > { %3299 = vsyncadd (%p4003_p0), %s295_s23, 4294965248  ;;  %p4004_p11 = scmp.eq.s32.totalorder %s3403_s28, 0 }
  0x82   : > { %3301 = dma.done.wait (%p4004_p11), [#allocation6], 12288   ;;  %p4005_p8 = pmov %p4004_p11 }
  0x84   : > { %3303 = vsyncadd (%p4005_p8), [#allocation6], 4294955008  ;;  %p4006_p13 = pmov %p4005_p8 }
  0x85   : > { %p4007_p6 = pmov %p4005_p8 }
  0x86   : > { %3305 = dma.done.wait (%p4006_p13), [#allocation9], 3072  }
  0x87   : > { %3307 = vsyncadd (%p4007_p6), [#allocation9], 4294964224  ;;  %v3338_v0 = vmov 0   ;;  %v2954_v1 = vld [vmem:[#allocation5 + $0x4] ss:$12 sps:$4 sm:$0xff]   ;;  %v345_v10 = vld [vmem:[%s3581_s12 + $0x8] sm:$0xff] }
  0x88   : > { %577 = vmatprep.mubr.bf16.mxu0 %v3338_v0  ;;  %v2956_v2 = vld [vmem:[#allocation5] ss:$12 sps:$4 sm:$0xff]   ;;  %545 = vmatprep.subr.bf16.mxu0 %v2954_v1  ;;  %v2957_v3 = vld [vmem:[#allocation5 + $0x1c] ss:$12 sps:$4 sm:$0xff]   ;;  %v2959_v4 = vld [vmem:[#allocation5 + $0x18] ss:$12 sps:$4 sm:$0xff]  }
  0x89   : > { %546 = vmatpush1.bf16.msra.mxu0 %v2956_v2  ;;  %v2960_v5 = vld [vmem:[#allocation5 + $0x34] ss:$12 sps:$4 sm:$0xff]   ;;  %v2962_v6 = vld [vmem:[#allocation5 + $0x30] ss:$12 sps:$4 sm:$0xff]   ;;  %v2963_v7 = vld [vmem:[#allocation5 + $0x4c] ss:$12 sps:$4 sm:$0xff]  }
  0x8a   : > { %547 = vmatprep.subr.bf16.mxu0 %v2957_v3  ;;  %v344_v8 = vld [vmem:[%s3581_s12] sm:$0xff]  ;;  %v2965_v9 = vld [vmem:[#allocation5 + $0x48] ss:$12 sps:$4 sm:$0xff]   ;;  %v2981_v20 = vld [vmem:[#allocation5 + $0x50] ss:$12 sps:$4 sm:$0xff]   ;;  %s3901_s29 = scalar_lea.vmem [#allocation10], %s2383_s16 }
  0x8b   : > { %v2966_v11 = vld [vmem:[#allocation5 + $0x64] ss:$12 sps:$4 sm:$0xff]   ;;  %v360_v12 = vpack.c.bf16 %v345_v10, %v344_v8  ;;  %v2968_v13 = vld [vmem:[#allocation5 + $0x60] ss:$12 sps:$4 sm:$0xff]   ;;  %v2978_v14 = vld [vmem:[#allocation5 + $0x8] ss:$12 sps:$4 sm:$0xff]  }
  0x8c   : > { %v2979_v15 = vld [vmem:[#allocation5 + $0x20] ss:$12 sps:$4 sm:$0xff]   ;;  %v2969_v16 = vld [vmem:[#allocation5 + $0x7c] ss:$12 sps:$4 sm:$0xff]   ;;  %2692 = vmatprep.subr.bf16.mxu1 %v2978_v14  ;;  %v2980_v17 = vld [vmem:[#allocation5 + $0x38] ss:$12 sps:$4 sm:$0xff]  }
  0x8d   : > { %548 = vmatpush1.bf16.msra.mxu0 %v2959_v4  ;;  %2708 = vmatprep.mubr.bf16.mxu1 %v360_v12  ;;  %v2971_v18 = vld [vmem:[#allocation5 + $0x78] ss:$12 sps:$4 sm:$0xff]   ;;  %v2972_v19 = vld [vmem:[#allocation5 + $0x94] ss:$12 sps:$4 sm:$0xff]   ;;  %v2974_v21 = vld [vmem:[#allocation5 + $0x90] ss:$12 sps:$4 sm:$0xff]  }
  0x8e   : > { %549 = vmatprep.subr.bf16.mxu0 %v2960_v5  ;;  %2693 = vmatpush3.bf16.msra.mxu1 %v2978_v14  ;;  %v2975_v22 = vld [vmem:[#allocation5 + $0xac] ss:$12 sps:$4 sm:$0xff]   ;;  %v2982_v23 = vld [vmem:[#allocation5 + $0x68] ss:$12 sps:$4 sm:$0xff]   ;;  %v2988_v25 = vld [vmem:[#allocation7 + $0x4] ss:$12 sps:$4 sm:$0xff]  }
  0x8f   : > { %2694 = vmatprep.subr.bf16.mxu1 %v2979_v15  ;;  %v2977_v24 = vld [vmem:[#allocation5 + $0xa8] ss:$12 sps:$4 sm:$0xff]   ;;  %v2983_v26 = vld [vmem:[#allocation5 + $0x80] ss:$12 sps:$4 sm:$0xff]   ;;  %v2984_v30 = vld [vmem:[#allocation5 + $0x98] ss:$12 sps:$4 sm:$0xff]  }
  0x90   : > { %v2986_v27 = vld [vmem:[#allocation7] ss:$12 sps:$4 sm:$0xff]   ;;  %v2991_v28 = vld [vmem:[#allocation7 + $0x1c] ss:$12 sps:$4 sm:$0xff]   ;;  %v346_v29 = vld [vmem:[%s3581_s12 + $0x10] sm:$0xff]  ;;  %s2515_s11 = sshll.u32 %s3403_s28, 11 }
  0x91   : > { %550 = vmatpush1.bf16.msra.mxu0 %v2962_v6  ;;  %v347_v31 = vld [vmem:[%s3581_s12 + $0x18] sm:$0xff]  ;;  %v2994_v33 = vld [vmem:[#allocation7 + $0x34] ss:$12 sps:$4 sm:$0xff]   ;;  %v349_v39 = vld [vmem:[%s3581_s12 + $0x28] sm:$0xff]  ;;  %s2271_s17 = sshll.u32 %s3901_s29, 4  ;;  %s3932_s16 = scalar_lea.hbm %s3988_s7, %s2515_s11  ;;  %s3934_s17 = int_to_ptr.vmem [resolvable:$true] %s2271_s17 }
  0x92   : > { %551 = vmatprep.subr.bf16.mxu0 %v2963_v7  ;;  %2695 = vmatpush3.bf16.msra.mxu1 %v2979_v15  ;;  %v2989_v32 = vld [vmem:[#allocation7 + $0x18] ss:$12 sps:$4 sm:$0xff]   ;;  %v361_v34 = vpack.c.bf16 %v347_v31, %v346_v29  ;;  %v2985_v35 = vld [vmem:[#allocation5 + $0xb0] ss:$12 sps:$4 sm:$0xff]   ;;  %v3013_v40 = vld [vmem:[#allocation7 + $0xc8] ss:$12 sps:$4 sm:$0xff]  }
  0x93   : > { %2696 = vmatprep.subr.bf16.mxu1 %v2980_v17  ;;  %v2992_v36 = vld [vmem:[#allocation7 + $0x30] ss:$12 sps:$4 sm:$0xff]   ;;  %v2997_v37 = vld [vmem:[#allocation7 + $0x4c] ss:$12 sps:$4 sm:$0xff]   ;;  %v348_v38 = vld [vmem:[%s3581_s12 + $0x20] sm:$0xff]  ;;  %s2258_s28 = scalar_lea.sflag [#allocation4], %s3575_s21 }
  0x94   : > { %v2995_v41 = vld [vmem:[#allocation7 + $0x48] ss:$12 sps:$4 sm:$0xff]   ;;  %v3000_v42 = vld [vmem:[#allocation7 + $0x64] ss:$12 sps:$4 sm:$0xff]   ;;  %v362_v44 = vpack.c.bf16 %v349_v39, %v348_v38  ;;  %v3018_v45 = vld [vmem:[#allocation7 + $0xe0] ss:$12 sps:$4 sm:$0xff]  }
  0x95   : > { %552 = vmatpush1.bf16.msra.mxu0 %v2965_v9  ;;  %v3014_v43 = vld [vmem:[#allocation7 + $0x8] ss:$12 sps:$4 sm:$0xff]   ;;  %v2998_v46 = vld [vmem:[#allocation7 + $0x60] ss:$12 sps:$4 sm:$0xff]   ;;  %v351_v49 = vld [vmem:[%s3581_s12 + $0x38] sm:$0xff]  ;;  %s3252_s23 = scalar_lea.vmem %s3934_s17, 2048 }
  0x96   : > { %553 = vmatprep.subr.bf16.mxu0 %v2966_v11  ;;  %2697 = vmatpush3.bf16.msra.mxu1 %v2980_v17  ;;  %v3003_v47 = vld [vmem:[#allocation7 + $0x7c] ss:$12 sps:$4 sm:$0xff]   ;;  %v350_v48 = vld [vmem:[%s3581_s12 + $0x30] sm:$0xff]  ;;  %v3019_v50 = vld [vmem:[#allocation7 + $0x20] ss:$12 sps:$4 sm:$0xff]   ;;  %p3253_p10 = scmp.ne.s32.totalorder %s3934_s17, %s3252_s23 }
  0x97   : > { %2698 = vmatprep.subr.bf16.mxu1 %v2981_v20  ;;  %v352_v51 = vld [vmem:[%s3581_s12 + $0x40] sm:$0xff]  ;;  %v353_v54 = vld [vmem:[%s3581_s12 + $0x48] sm:$0xff]  ;;  %v3004_v56 = vld [vmem:[#allocation7 + $0x90] ss:$12 sps:$4 sm:$0xff]   ;;  %v363_v59 = vpack.c.bf16 %v351_v49, %v350_v48 }
  0x98   : > { %v3023_v52 = vld [vmem:[#allocation7 + $0xf8] ss:$12 sps:$4 sm:$0xff]   ;;  %v3006_v55 = vld [vmem:[#allocation7 + $0x94] ss:$12 sps:$4 sm:$0xff]   ;;  %v3028_v58 = vld [vmem:[#allocation7 + $0x110] ss:$12 sps:$4 sm:$0xff]   ;;  %v364_v61 = vpack.c.bf16 %v353_v54, %v352_v51  ;;  %p3254_p3 = pnand %p3253_p10, %p3527_p5 }
  0x99   : > { %554 = vmatpush1.bf16.msra.mxu0 %v2968_v13  ;;  %v3001_v53 = vld [vmem:[#allocation7 + $0x78] ss:$12 sps:$4 sm:$0xff]   ;;  %v3029_v62 = vld [vmem:[#allocation7 + $0x50] ss:$12 sps:$4 sm:$0xff]   ;;  %v3033_v63 = vld [vmem:[#allocation7 + $0x128] ss:$12 sps:$4 sm:$0xff]  }
  0x9a   : > { %555 = vmatprep.subr.bf16.mxu0 %v2969_v16  ;;  %2699 = vmatpush3.bf16.msra.mxu1 %v2981_v20  ;;  %v3024_v57 = vld [vmem:[#allocation7 + $0x38] ss:$12 sps:$4 sm:$0xff]   ;;  %v354_v1 = vld [vmem:[%s3581_s12 + $0x50] sm:$0xff]  ;;  %v357_v5 = vld [vmem:[%s3581_s12 + $0x68] sm:$0xff]  ;;  %p3255_p7 = pneg %p3254_p3 }
  0x9b   : > { %2700 = vmatprep.subr.bf16.mxu1 %v2982_v23  ;;  %v3009_v60 = vld [vmem:[#allocation7 + $0xac] ss:$12 sps:$4 sm:$0xff]   ;;  %v3007_v3 = vld [vmem:[#allocation7 + $0xa8] ss:$12 sps:$4 sm:$0xff]   ;;  %v356_v4 = vld [vmem:[%s3581_s12 + $0x60] sm:$0xff] }
  0x9c   : > { %v355_v2 = vld [vmem:[%s3581_s12 + $0x58] sm:$0xff]  ;;  %v3012_v6 = vld [vmem:[#allocation7 + $0xc4] ss:$12 sps:$4 sm:$0xff]   ;;  %v3034_v7 = vld [vmem:[#allocation7 + $0x68] ss:$12 sps:$4 sm:$0xff]  }
  0x9d   : > { %556 = vmatpush1.bf16.msra.mxu0 %v2971_v18  ;;  %v3038_v8 = vld [vmem:[#allocation7 + $0x140] ss:$12 sps:$4 sm:$0xff]   ;;  %v365_v10 = vpack.c.bf16 %v355_v2, %v354_v1  ;;  %v3017_v11 = vld [vmem:[#allocation7 + $0xdc] ss:$12 sps:$4 sm:$0xff]   ;;  %v358_v13 = vld [vmem:[%s3581_s12 + $0x70] sm:$0xff] }
  0x9e   : > { %557 = vmatprep.subr.bf16.mxu0 %v2972_v19  ;;  %2701 = vmatpush3.bf16.msra.mxu1 %v2982_v23  ;;  %v3010_v9 = vld [vmem:[#allocation7 + $0xc0] ss:$12 sps:$4 sm:$0xff]   ;;  %v359_v14 = vld [vmem:[%s3581_s12 + $0x78] sm:$0xff]  ;;  %v3025_v20 = vld [vmem:[#allocation7 + $0x108] ss:$12 sps:$4 sm:$0xff]   ;;  %s3339_s12 = smov [#allocation10]  }
  0x9f   : > { %2702 = vmatprep.subr.bf16.mxu1 %v2983_v26  ;;  %v3015_v15 = vld [vmem:[#allocation7 + $0xd8] ss:$12 sps:$4 sm:$0xff]   ;;  %v3022_v16 = vld [vmem:[#allocation7 + $0xf4] ss:$12 sps:$4 sm:$0xff]   ;;  %v3020_v17 = vld [vmem:[#allocation7 + $0xf0] ss:$12 sps:$4 sm:$0xff]   ;;  %v367_v18 = vpack.c.bf16 %v359_v14, %v358_v13 }
  0xa0   : > { %v3027_v19 = vld [vmem:[#allocation7 + $0x10c] ss:$12 sps:$4 sm:$0xff]   ;;  %v3037_v23 = vld [vmem:[#allocation7 + $0x13c] ss:$12 sps:$4 sm:$0xff]   ;;  %v400_v39 = vld [vmem:[%s3983_s2] sm:$0x7] }
  0xa1   : > { %558 = vmatpush1.bf16.msra.mxu0 %v2974_v21  ;;  %v3032_v21 = vld [vmem:[#allocation7 + $0x124] ss:$12 sps:$4 sm:$0xff]   ;;  %s3256_s30 = sshll.u32 %s3339_s12, 4  ;;  %s3257_s30 = int_to_ptr.vmem [resolvable:$false] %s3256_s30 }
  0xa2   : > { %559 = vmatprep.subr.bf16.mxu0 %v2975_v22  ;;  %2703 = vmatpush3.bf16.msra.mxu1 %v2983_v26  ;;  %v3030_v22 = vld [vmem:[#allocation7 + $0x120] ss:$12 sps:$4 sm:$0xff]   ;;  %v3044_v29 = vld [vmem:[#allocation7 + $0x98] ss:$12 sps:$4 sm:$0xff]   ;;  %v3048_v31 = vld [vmem:[#allocation7 + $0x170] ss:$12 sps:$4 sm:$0xff]   ;;  %p3259_p12 = scmp.lt.s32.totalorder %s3934_s17, %s3257_s30 }
  0xa3   : > { %2704 = vmatprep.subr.bf16.mxu1 %v2984_v30  ;;  %v3042_v26 = vld [vmem:[#allocation7 + $0x154] ss:$12 sps:$4 sm:$0xff]   ;;  %s3258_s9 = scalar_lea.vmem %s3257_s30, 4096 }
  0xa4   : > { %p3260_p2 = scmp.lt.s32.totalorder %s3258_s9, %s3252_s23 }
  0xa5   : > { %560 = vmatpush1.bf16.msra.mxu0 %v2977_v24  ;;  %v3035_v24 = vld [vmem:[#allocation7 + $0x138] ss:$12 sps:$4 sm:$0xff]  }
  0xa6   : > { %1324 = vmatprep.subr.bf16.mxu0 %v2988_v25  ;;  %2705 = vmatpush3.bf16.msra.mxu1 %v2984_v30  ;;  %v3039_v25 = vld [vmem:[#allocation7 + $0x80] ss:$12 sps:$4 sm:$0xff]   ;;  %p3261_p1 = por %p3260_p2, %p3259_p12 }
  0xa7   : > { %2706 = vmatprep.subr.bf16.mxu1 %v2985_v35  ;;  %v3047_v30 = vld [vmem:[#allocation7 + $0x16c] ss:$12 sps:$4 sm:$0xff]  }
  0xa8   : > { %578 = vmatmul.mubr.bf16.vlgmr.msra.gmra.mrb[0].mxu0 %v360_v12  ;;  %v366_v12 = vpack.c.bf16 %v357_v5, %v356_v4  ;;  %p3262_p4 = pnand %p3261_p1, %p3255_p7 }
  0xa9   : > { %587 = vmatprep.mubr.bf16.mxu0 %v3338_v0  ;;  %1325 = vmatpush1.bf16.msra.mxu0 %v2986_v27  ;;  %v3043_v27 = vld [vmem:[#allocation7 + $0x158] ss:$12 sps:$4 sm:$0xff]  }
  0xaa   : > { %1326 = vmatprep.subr.bf16.mxu0 %v2991_v28  ;;  %2707 = vmatpush3.bf16.msra.mxu1 %v2985_v35  ;;  %v3040_v28 = vld [vmem:[#allocation7 + $0x150] ss:$12 sps:$4 sm:$0xff]   ;;  %v3065_v35 = vld [vmem:[#allocation7 + $0x188] ss:$12 sps:$4 sm:$0xff]  }
  0xab   : > { %2532 = vmatprep.subr.bf16.mxu1 %v3013_v40 }
  0xad   : > { %1327 = vmatpush1.bf16.msra.mxu0 %v2989_v32  ;;  %2709 = vmatmul.mubr.bf16.vlgmr.msra.gmra.mrb[0].mxu1 %v361_v34  ;;  %v3045_v32 = vld [vmem:[#allocation7 + $0x168] ss:$12 sps:$4 sm:$0xff]  }
  0xae   : > { %1328 = vmatprep.subr.bf16.mxu0 %v2994_v33  ;;  %2712 = vmatprep.mubr.bf16.mxu1 %v362_v44  ;;  %v3049_v33 = vld [vmem:[#allocation7 + $0xb0] ss:$12 sps:$4 sm:$0xff]  }
  0xaf   : > { %2533 = vmatpush3.bf16.msra.mxu1 %v3014_v43 }
  0xb0   : > { %588 = vmatmul.mubr.bf16.gmra.mrb[4].mxu0 %v361_v34  ;;  %2534 = vmatprep.subr.bf16.mxu1 %v3018_v45  ;;  %v3052_v34 = vld [vmem:[#allocation7 + $0x184] ss:$12 sps:$4 sm:$0xff]  }
  0xb1   : > { %597 = vmatprep.mubr.bf16.mxu0 %v3338_v0  ;;  %1329 = vmatpush1.bf16.msra.mxu0 %v2992_v36  ;;  %v402_v36 = vlaneseq }
  0xb2   : > { %1330 = vmatprep.subr.bf16.mxu0 %v2997_v37 }
  0xb3   : > { %2535 = vmatpush3.bf16.msra.mxu1 %v3019_v50  ;;  %v3619_v37 = vshrl.u32 %v402_v36, 7 }
  0xb4   : > { %2536 = vmatprep.subr.bf16.mxu1 %v3023_v52 }
  0xb5   : > { %1331 = vmatpush1.bf16.msra.mxu0 %v2995_v41  ;;  %2713 = vmatmul.mubr.bf16.gmra.mrb[4].mxu1 %v363_v59  ;;  %v404_v38 = vsub.s32 0, %v3619_v37  ;;  %v408_v40 = vsub.s32 1, %v3619_v37 }
  0xb6   : > { %1332 = vmatprep.subr.bf16.mxu0 %v3000_v42  ;;  %2716 = vmatprep.mubr.bf16.mxu1 %v364_v61 }
  0xb7   : > { %2537 = vmatpush3.bf16.msra.mxu1 %v3024_v57  ;;  %v3628_v41 = vrot.slane %v400_v39, %v404_v38  ;;  %v3632_v42 = vrot.slane %v400_v39, %v408_v40 }
  0xb8   : > { %598 = vmatmul.mubr.bf16.gmra.mrb[8].mxu0 %v362_v44  ;;  %2538 = vmatprep.subr.bf16.mxu1 %v3028_v58 }
  0xb9   : > { %607 = vmatprep.mubr.bf16.mxu0 %v3338_v0  ;;  %1333 = vmatpush1.bf16.msra.mxu0 %v2998_v46 }
  0xba   : > { %1334 = vmatprep.subr.bf16.mxu0 %v3003_v47 }
  0xbb   : > { %2539 = vmatpush3.bf16.msra.mxu1 %v3029_v62  ;;  %v3055_v62 = vld [vmem:[#allocation7 + $0x19c] ss:$12 sps:$4 sm:$0xff]  }
  0xbc   : > { %2540 = vmatprep.subr.bf16.mxu1 %v3033_v63  ;;  %v3066_v63 = vld [vmem:[#allocation7 + $0x1a0] ss:$12 sps:$4 sm:$0xff]  }
  0xbd   : > { %1335 = vmatpush1.bf16.msra.mxu0 %v3001_v53  ;;  %2717 = vmatmul.mubr.bf16.gmra.mrb[8].mxu1 %v365_v10 }
  0xbe   : > { %1336 = vmatprep.subr.bf16.mxu0 %v3006_v55  ;;  %2720 = vmatprep.mubr.bf16.mxu1 %v366_v12 }
  0xbf   : > { %2541 = vmatpush3.bf16.msra.mxu1 %v3034_v7  ;;  %v3053_v7 = vld [vmem:[#allocation7 + $0x198] ss:$12 sps:$4 sm:$0xff]  }
  0xc0   : > { %608 = vmatmul.mubr.bf16.gmra.mrb[12].mxu0 %v363_v59  ;;  %2542 = vmatprep.subr.bf16.mxu1 %v3038_v8  ;;  %v3050_v59 = vld [vmem:[#allocation7 + $0x180] ss:$12 sps:$4 sm:$0xff]  }
  0xc1   : > { %617 = vmatprep.mubr.bf16.mxu0 %v3338_v0  ;;  %1337 = vmatpush1.bf16.msra.mxu0 %v3004_v56  ;;  %v412_v56 = vsub.s32 2, %v3619_v37 }
  0xc2   : > { %1338 = vmatprep.subr.bf16.mxu0 %v3009_v60 }
  0xc3   : > { %2543 = vmatpush3.bf16.msra.mxu1 %v3039_v25  ;;  %v3644_v5 = vrot.slane %v400_v39, %v412_v56 }
  0xc4   : > { %2544 = vmatprep.subr.bf16.mxu1 %v3043_v27 }
  0xc5   : > { %1339 = vmatpush1.bf16.msra.mxu0 %v3007_v3  ;;  %2721 = vmatmul.mubr.bf16.gmra.mrb[12].mxu1 %v367_v18 }
  0xc6   : > { %1340 = vmatprep.subr.bf16.mxu0 %v3012_v6 }
  0xc7   : > { %2545 = vmatpush3.bf16.msra.mxu1 %v3044_v29 }
  0xc8   : > { %618 = vmatmul.mubr.bf16.gmra.mrb[16].mxu0 %v364_v61  ;;  %2546 = vmatprep.subr.bf16.mxu1 %v3048_v31 }
  0xc9   : > { %627 = vmatprep.mubr.bf16.mxu0 %v3338_v0  ;;  %1341 = vmatpush1.bf16.msra.mxu0 %v3010_v9 }
  0xca   : > { %1342 = vmatprep.subr.bf16.mxu0 %v3017_v11  ;;  %v3070_v11 = vld [vmem:[#allocation7 + $0x1b8] ss:$12 sps:$4 sm:$0xff]  }
  0xcb   : > { %2547 = vmatpush3.bf16.msra.mxu1 %v3049_v33 }
  0xcc   : > { %2724 = vmatprep.subr.bf16.mxu1 %v3065_v35 }
  0xcd   : > { %1343 = vmatpush1.bf16.msra.mxu0 %v3015_v15 }
  0xce   : > { %1344 = vmatprep.subr.bf16.mxu0 %v3022_v16 }
  0xd0   : > { %628 = vmatmul.mubr.bf16.gmra.mrb[20].mxu0 %v365_v10  ;;  %v3058_v10 = vld [vmem:[#allocation7 + $0x1b4] ss:$12 sps:$4 sm:$0xff]  }
  0xd1   : > { %637 = vmatprep.mubr.bf16.mxu0 %v3338_v0  ;;  %1345 = vmatpush1.bf16.msra.mxu0 %v3020_v17 }
  0xd2   : > { %1346 = vmatprep.subr.bf16.mxu0 %v3027_v19 }
  0xd5   : > { %1347 = vmatpush1.bf16.msra.mxu0 %v3025_v20  ;;  %v3056_v20 = vld [vmem:[#allocation7 + $0x1b0] ss:$12 sps:$4 sm:$0xff]  }
  0xd6   : > { %1348 = vmatprep.subr.bf16.mxu0 %v3032_v21  ;;  %v3061_v21 = vld [vmem:[#allocation7 + $0x1cc] ss:$12 sps:$4 sm:$0xff]  }
  0xd8   : > { %638 = vmatmul.mubr.bf16.gmra.mrb[24].mxu0 %v366_v12 }
  0xd9   : > { %647 = vmatprep.mubr.bf16.mxu0 %v3338_v0  ;;  %1349 = vmatpush1.bf16.msra.mxu0 %v3030_v22 }
  0xda   : > { %1350 = vmatprep.subr.bf16.mxu0 %v3037_v23 }
  0xdd   : > { %1351 = vmatpush1.bf16.msra.mxu0 %v3035_v24 }
  0xde   : > { %1352 = vmatprep.subr.bf16.mxu0 %v3042_v26  ;;  %v3071_v26 = vld [vmem:[#allocation7 + $0x1d0] ss:$12 sps:$4 sm:$0xff]  }
  0xe0   : > { %648 = vmatmul.mubr.bf16.gmra.mrb[28].mxu0 %v367_v18 }
  0xe1   : > { %1353 = vmatpush1.bf16.msra.mxu0 %v3040_v28 }
  0xe2   : > { %1354 = vmatprep.subr.bf16.mxu0 %v3047_v30 }
  0xe5   : > { %1355 = vmatpush1.bf16.msra.mxu0 %v3045_v32 }
  0xe6   : > { %1437 = vmatprep.subr.bf16.mxu0 %v3052_v34 }
 0x17b   : > { %v579_v43 = vpop.f32.mrb[0].mxu0 }
 0x17c   : > { %v580_v44 = vadd.f32 %v579_v43, %v3628_v41  ;;  %v581_v45 = vpop.f32.mrb[1].mxu0  ;;  %v3059_v43 = vld [vmem:[#allocation7 + $0x1c8] ss:$12 sps:$4 sm:$0xff]  }
 0x17d   : > { %v582_v46 = vadd.f32 %v581_v45, %v3632_v42  ;;  %v583_v47 = vpop.f32.mrb[2].mxu0 }
 0x17e   : > { %v584_v48 = vadd.f32 %v583_v47, %v3628_v41  ;;  %v585_v49 = vpop.f32.mrb[3].mxu0  ;;  %v755_v51 = vmax.f32 %v580_v44, 0.0  ;;  %v3064_v47 = vld [vmem:[#allocation7 + $0x1e4] ss:$12 sps:$4 sm:$0xff]  }
 0x17f   : > { %v586_v50 = vadd.f32 %v585_v49, %v3632_v42  ;;  %v756_v53 = vmax.f32 %v582_v46, 0.0 }
 0x180   : > { %v758_v52 = vmax.f32 %v584_v48, 0.0  ;;  %v2710_v14 = vpop.f32.mrb[0].mxu1  ;;  %v3075_v48 = vld [vmem:[#allocation7 + $0x1e8] ss:$12 sps:$4 sm:$0xff]  }
 0x181   : > { %v759_v54 = vmax.f32 %v586_v50, 0.0  ;;  %v701_v16 = vadd.f32 %v2710_v14, %v3644_v5  ;;  %v692_v17 = vpop.f32.mrb[1].mxu1 }
 0x182   : > { %v803_v55 = vpack.c.bf16 %v758_v52, %v755_v51  ;;  %v693_v22 = vadd.f32 %v692_v17, %v3644_v5  ;;  %v2711_v23 = vpop.f32.mrb[2].mxu1 }
 0x183   : > { %v804_v57 = vpack.c.bf16 %v759_v54, %v756_v53  ;;  %v589_v58 = vpop.f32.mrb[4].mxu0  ;;  %v763_v27 = vmax.f32 %v701_v16, 0.0  ;;  %v704_v28 = vadd.f32 %v2711_v23, %v3644_v5  ;;  %v695_v29 = vpop.f32.mrb[3].mxu1  ;;  %v3067_v16 = vld [vmem:[#allocation7 + $0x1f8] ss:$12 sps:$4 sm:$0xff]  }
 0x184   : > { %v590_v60 = vadd.f32 %v589_v58, %v3628_v41  ;;  %v591_v61 = vpop.f32.mrb[5].mxu0  ;;  %v757_v32 = vmax.f32 %v693_v22, 0.0  ;;  %v696_v33 = vadd.f32 %v695_v29, %v3644_v5 }
 0x185   : > { %v592_v1 = vadd.f32 %v591_v61, %v3632_v42  ;;  %v593_v2 = vpop.f32.mrb[6].mxu0  ;;  %1356 = vmatprep.mubr.bf16.mxu0 %v804_v57  ;;  %1582 = vmatprep.mubr.bf16.mxu1 %v804_v57  ;;  %v766_v36 = vmax.f32 %v704_v28, 0.0  ;;  %v3069_v61 = vld [vmem:[#allocation7 + $0x1fc] ss:$12 sps:$4 sm:$0xff]  }
 0x186   : > { %v594_v3 = vadd.f32 %v593_v2, %v3628_v41  ;;  %v595_v4 = vpop.f32.mrb[7].mxu0  ;;  %1357 = vmatmul.mubr.bf16.vlgmr.msra.gmra.mrb[32].mxu0 %v803_v55  ;;  %1583 = vmatmul.mubr.bf16.vlgmr.msra.gmra.mrb[16].mxu1 %v803_v55  ;;  %v761_v8 = vmax.f32 %v590_v60, 0.0  ;;  %v760_v44 = vmax.f32 %v696_v33, 0.0  ;;  %v3062_v60 = vld [vmem:[#allocation7 + $0x1e0] ss:$12 sps:$4 sm:$0xff]  }
 0x187   : > { %v596_v6 = vadd.f32 %v595_v4, %v3632_v42  ;;  %1438 = vmatpush1.bf16.msra.mxu0 %v3050_v59  ;;  %2725 = vmatpush3.bf16.msra.mxu1 %v3065_v35  ;;  %v762_v12 = vmax.f32 %v592_v1, 0.0  ;;  %v3655_v49 = vpack.c.bf16 %v766_v36, %v763_v27  ;;  %v3079_v33 = vld [vmem:[#allocation7 + $0x22c] ss:$12 sps:$4 sm:$0xff]  }
 0x188   : > { %v764_v9 = vmax.f32 %v594_v3, 0.0  ;;  %1439 = vmatprep.subr.bf16.mxu0 %v3055_v62  ;;  %2726 = vmatprep.subr.bf16.mxu1 %v3066_v63  ;;  %v3657_v52 = vpack.c.bf16 %v760_v44, %v757_v32  ;;  %v2714_v53 = vpop.f32.mrb[4].mxu1  ;;  %v3076_v3 = vld [vmem:[#allocation7 + $0x200] ss:$12 sps:$4 sm:$0xff]   ;;  %v3072_v32 = vld [vmem:[#allocation7 + $0x210] ss:$12 sps:$4 sm:$0xff]  }
 0x189   : > { %v765_v13 = vmax.f32 %v596_v6, 0.0  ;;  %v717_v55 = vadd.f32 %v2714_v53, %v3644_v5  ;;  %v708_v57 = vpop.f32.mrb[5].mxu1 }
 0x18a   : > { %v806_v15 = vpack.c.bf16 %v764_v9, %v761_v8  ;;  %v709_v62 = vadd.f32 %v708_v57, %v3644_v5 }
 0x18b   : > { %v807_v18 = vpack.c.bf16 %v765_v13, %v762_v12  ;;  %v599_v19 = vpop.f32.mrb[8].mxu0  ;;  %1440 = vmatpush1.bf16.msra.mxu0 %v3053_v7  ;;  %2727 = vmatpush3.bf16.msra.mxu1 %v3066_v63  ;;  %v2715_v63 = vpop.f32.mrb[6].mxu1  ;;  %v775_v4 = vmax.f32 %v717_v55, 0.0 }
 0x18c   : > { %v600_v24 = vadd.f32 %v599_v19, %v3628_v41  ;;  %v601_v25 = vpop.f32.mrb[9].mxu0  ;;  %1441 = vmatprep.subr.bf16.mxu0 %v3058_v10  ;;  %2728 = vmatprep.subr.bf16.mxu1 %v3070_v11  ;;  %v720_v6 = vadd.f32 %v2715_v63, %v3644_v5  ;;  %v711_v7 = vpop.f32.mrb[7].mxu1  ;;  %v769_v10 = vmax.f32 %v709_v62, 0.0 }
 0x18d   : > { %v602_v30 = vadd.f32 %v601_v25, %v3632_v42  ;;  %v603_v31 = vpop.f32.mrb[10].mxu0  ;;  %1366 = vmatprep.mubr.bf16.mxu0 %v807_v18  ;;  %1590 = vmatprep.mubr.bf16.mxu1 %v807_v18 }
 0x18e   : > { %v604_v34 = vadd.f32 %v603_v31, %v3628_v41  ;;  %v605_v35 = vpop.f32.mrb[11].mxu0  ;;  %1367 = vmatmul.mubr.bf16.gmra.mrb[36].mxu0 %v806_v15  ;;  %1591 = vmatmul.mubr.bf16.gmra.mrb[20].mxu1 %v806_v15  ;;  %v767_v45 = vmax.f32 %v600_v24, 0.0  ;;  %v778_v14 = vmax.f32 %v720_v6, 0.0 }
 0x18f   : > { %v606_v39 = vadd.f32 %v605_v35, %v3632_v42  ;;  %1442 = vmatpush1.bf16.msra.mxu0 %v3056_v20  ;;  %2729 = vmatpush3.bf16.msra.mxu1 %v3070_v11  ;;  %v768_v50 = vmax.f32 %v602_v30, 0.0  ;;  %v712_v11 = vadd.f32 %v711_v7, %v3644_v5  ;;  %v3074_v20 = vld [vmem:[#allocation7 + $0x214] ss:$12 sps:$4 sm:$0xff]  }
 0x190   : > { %v770_v46 = vmax.f32 %v604_v34, 0.0  ;;  %1443 = vmatprep.subr.bf16.mxu0 %v3061_v21  ;;  %2730 = vmatprep.subr.bf16.mxu1 %v3071_v26  ;;  %v3080_v21 = vld [vmem:[#allocation7 + $0x218] ss:$12 sps:$4 sm:$0xff]   ;;  %v3667_v22 = vpack.c.bf16 %v778_v14, %v775_v4 }
 0x191   : > { %v771_v51 = vmax.f32 %v606_v39, 0.0  ;;  %v772_v17 = vmax.f32 %v712_v11, 0.0 }
 0x192   : > { %v809_v54 = vpack.c.bf16 %v770_v46, %v767_v45 }
 0x193   : > { %v810_v58 = vpack.c.bf16 %v771_v51, %v768_v50  ;;  %v609_v59 = vpop.f32.mrb[12].mxu0  ;;  %1444 = vmatpush1.bf16.msra.mxu0 %v3059_v43  ;;  %2731 = vmatpush3.bf16.msra.mxu1 %v3071_v26  ;;  %v3669_v25 = vpack.c.bf16 %v772_v17, %v769_v10  ;;  %v2718_v26 = vpop.f32.mrb[8].mxu1  ;;  %v3081_v43 = vld [vmem:[#allocation7 + $0x230] ss:$12 sps:$4 sm:$0xff]  }
 0x194   : > { %v610_v1 = vadd.f32 %v609_v59, %v3628_v41  ;;  %v611_v2 = vpop.f32.mrb[13].mxu0  ;;  %1445 = vmatprep.subr.bf16.mxu0 %v3064_v47  ;;  %2732 = vmatprep.subr.bf16.mxu1 %v3075_v48  ;;  %v733_v28 = vadd.f32 %v2718_v26, %v3644_v5  ;;  %v724_v29 = vpop.f32.mrb[9].mxu1 }
 0x195   : > { %v612_v8 = vadd.f32 %v611_v2, %v3632_v42  ;;  %v613_v9 = vpop.f32.mrb[14].mxu0  ;;  %1376 = vmatprep.mubr.bf16.mxu0 %v810_v58  ;;  %1598 = vmatprep.mubr.bf16.mxu1 %v810_v58  ;;  %v725_v34 = vadd.f32 %v724_v29, %v3644_v5  ;;  %v2719_v35 = vpop.f32.mrb[10].mxu1  ;;  %v3077_v58 = vld [vmem:[#allocation7 + $0x228] ss:$12 sps:$4 sm:$0xff]  }
 0x196   : > { %v614_v12 = vadd.f32 %v613_v9, %v3628_v41  ;;  %v615_v13 = vpop.f32.mrb[15].mxu0  ;;  %1377 = vmatmul.mubr.bf16.gmra.mrb[40].mxu0 %v809_v54  ;;  %1599 = vmatmul.mubr.bf16.gmra.mrb[24].mxu1 %v809_v54  ;;  %v773_v18 = vmax.f32 %v610_v1, 0.0  ;;  %v787_v44 = vmax.f32 %v733_v28, 0.0  ;;  %v736_v45 = vadd.f32 %v2719_v35, %v3644_v5  ;;  %v727_v46 = vpop.f32.mrb[11].mxu1 }
 0x197   : > { %v616_v15 = vadd.f32 %v615_v13, %v3632_v42  ;;  %1446 = vmatpush1.bf16.msra.mxu0 %v3062_v60  ;;  %2733 = vmatpush3.bf16.msra.mxu1 %v3075_v48  ;;  %v774_v23 = vmax.f32 %v612_v8, 0.0  ;;  %v781_v50 = vmax.f32 %v725_v34, 0.0  ;;  %v728_v51 = vadd.f32 %v727_v46, %v3644_v5 }
 0x198   : > { %v776_v19 = vmax.f32 %v614_v12, 0.0  ;;  %1447 = vmatprep.subr.bf16.mxu0 %v3069_v61  ;;  %2734 = vmatprep.subr.bf16.mxu1 %v3076_v3  ;;  %v790_v55 = vmax.f32 %v736_v45, 0.0 }
 0x199   : > { %v777_v24 = vmax.f32 %v616_v15, 0.0  ;;  %v784_v59 = vmax.f32 %v728_v51, 0.0 }
 0x19a   : > { %v812_v27 = vpack.c.bf16 %v776_v19, %v773_v18  ;;  %v3679_v62 = vpack.c.bf16 %v790_v55, %v787_v44 }
 0x19b   : > { %v813_v30 = vpack.c.bf16 %v777_v24, %v774_v23  ;;  %v619_v31 = vpop.f32.mrb[16].mxu0  ;;  %1448 = vmatpush1.bf16.msra.mxu0 %v3067_v16  ;;  %2735 = vmatpush3.bf16.msra.mxu1 %v3076_v3  ;;  %v3681_v2 = vpack.c.bf16 %v784_v59, %v781_v50  ;;  %v2722_v3 = vpop.f32.mrb[12].mxu1 }
 0x19c   : > { %v620_v36 = vadd.f32 %v619_v31, %v3628_v41  ;;  %v621_v39 = vpop.f32.mrb[17].mxu0  ;;  %1449 = vmatprep.subr.bf16.mxu0 %v3074_v20  ;;  %2736 = vmatprep.subr.bf16.mxu1 %v3080_v21  ;;  %v749_v6 = vadd.f32 %v2722_v3, %v3644_v5  ;;  %v740_v7 = vpop.f32.mrb[13].mxu1 }
 0x19d   : > { %v622_v47 = vadd.f32 %v621_v39, %v3632_v42  ;;  %v623_v48 = vpop.f32.mrb[18].mxu0  ;;  %1386 = vmatprep.mubr.bf16.mxu0 %v813_v30  ;;  %1606 = vmatprep.mubr.bf16.mxu1 %v813_v30  ;;  %v741_v10 = vadd.f32 %v740_v7, %v3644_v5  ;;  %v2723_v11 = vpop.f32.mrb[14].mxu1 }
 0x19e   : > { %v624_v53 = vadd.f32 %v623_v48, %v3628_v41  ;;  %v625_v54 = vpop.f32.mrb[19].mxu0  ;;  %1387 = vmatmul.mubr.bf16.gmra.mrb[44].mxu0 %v812_v27  ;;  %1607 = vmatmul.mubr.bf16.gmra.mrb[28].mxu1 %v812_v27  ;;  %v779_v60 = vmax.f32 %v620_v36, 0.0  ;;  %v799_v14 = vmax.f32 %v749_v6, 0.0  ;;  %v752_v15 = vadd.f32 %v2723_v11, %v3644_v5  ;;  %v743_v16 = vpop.f32.mrb[15].mxu1  ;;  %v3091_v11 = vld [vmem:[#allocation8 + $0x58] sm:$0xff]  }
 0x19f   : > { %v626_v57 = vadd.f32 %v625_v54, %v3632_v42  ;;  %1450 = vmatpush1.bf16.msra.mxu0 %v3072_v32  ;;  %2737 = vmatpush3.bf16.msra.mxu1 %v3080_v21  ;;  %v780_v63 = vmax.f32 %v622_v47, 0.0  ;;  %v793_v19 = vmax.f32 %v741_v10, 0.0  ;;  %v744_v20 = vadd.f32 %v743_v16, %v3644_v5  ;;  %v3095_v16 = vld [vmem:[#allocation8 + $0x20] sm:$0xff]  }
 0x1a0   : > { %v782_v61 = vmax.f32 %v624_v53, 0.0  ;;  %1451 = vmatprep.subr.bf16.mxu0 %v3079_v33  ;;  %2738 = vmatprep.subr.bf16.mxu1 %v3081_v43  ;;  %v802_v24 = vmax.f32 %v752_v15, 0.0  ;;  %v3743_v15 = vld [vmem:[#allocation8 + $0xa0] sm:$0xff]  }
 0x1a1   : > { %v783_v1 = vmax.f32 %v626_v57, 0.0  ;;  %v796_v27 = vmax.f32 %v744_v20, 0.0  ;;  %v3100_v20 = vld [vmem:[#allocation8 + $0x70] sm:$0xff]  }
 0x1a2   : > { %v815_v4 = vpack.c.bf16 %v782_v61, %v779_v60  ;;  %v3691_v30 = vpack.c.bf16 %v802_v24, %v799_v14  ;;  %v3094_v14 = vld [vmem:[#allocation8 + $0x60] sm:$0xff]   ;;  %v3103_v24 = vld [vmem:[#allocation8 + $0x78] sm:$0xff]  }
 0x1a3   : > { %v816_v8 = vpack.c.bf16 %v783_v1, %v780_v63  ;;  %v629_v9 = vpop.f32.mrb[20].mxu0  ;;  %1452 = vmatpush1.bf16.msra.mxu0 %v3077_v58  ;;  %2739 = vmatpush3.bf16.msra.mxu1 %v3081_v43  ;;  %v3693_v33 = vpack.c.bf16 %v796_v27, %v793_v19  ;;  %v3747_v19 = vld [vmem:[#allocation8 + $0xa8] sm:$0xff]   ;;  %v3104_v27 = vld [vmem:[#allocation8 + $0x38] sm:$0xff]  }
 0x1a4   : > { %v630_v12 = vadd.f32 %v629_v9, %v3628_v41  ;;  %v631_v13 = vpop.f32.mrb[21].mxu0 }
 0x1a5   : > { %v632_v17 = vadd.f32 %v631_v13, %v3632_v42  ;;  %v633_v18 = vpop.f32.mrb[22].mxu0  ;;  %1396 = vmatprep.mubr.bf16.mxu0 %v816_v8  ;;  %1614 = vmatprep.mubr.bf16.mxu1 %v816_v8  ;;  %v3739_v13 = vld [vmem:[#allocation8 + $0x98] sm:$0xff]  }
 0x1a6   : > { %v634_v21 = vadd.f32 %v633_v18, %v3628_v41  ;;  %v635_v23 = vpop.f32.mrb[23].mxu0  ;;  %1397 = vmatmul.mubr.bf16.gmra.mrb[48].mxu0 %v815_v4  ;;  %1615 = vmatmul.mubr.bf16.gmra.mrb[32].mxu1 %v815_v4  ;;  %v785_v28 = vmax.f32 %v630_v12, 0.0  ;;  %v3092_v12 = vld [vmem:[#allocation8 + $0x18] sm:$0xff]   ;;  %v3098_v18 = vld [vmem:[#allocation8 + $0x28] sm:$0xff]  }
 0x1a7   : > { %v636_v26 = vadd.f32 %v635_v23, %v3632_v42  ;;  %v786_v31 = vmax.f32 %v632_v17, 0.0  ;;  %v3097_v17 = vld [vmem:[#allocation8 + $0x68] sm:$0xff]   ;;  %v3101_v23 = vld [vmem:[#allocation8 + $0x30] sm:$0xff]  }
 0x1a8   : > { %v788_v29 = vmax.f32 %v634_v21, 0.0  ;;  %v3751_v21 = vld [vmem:[#allocation8 + $0xb0] sm:$0xff]  }
 0x1a9   : > { %v789_v32 = vmax.f32 %v636_v26, 0.0  ;;  %v3755_v26 = vld [vmem:[#allocation8 + $0xb8] sm:$0xff]  }
 0x1aa   : > { %v818_v34 = vpack.c.bf16 %v788_v29, %v785_v28 }
 0x1ab   : > { %v819_v35 = vpack.c.bf16 %v789_v32, %v786_v31  ;;  %v639_v5 = vpop.f32.mrb[24].mxu0 }
 0x1ac   : > { %v640_v36 = vadd.f32 %v639_v5, %v3628_v41  ;;  %v641_v39 = vpop.f32.mrb[25].mxu0 }
 0x1ad   : > { %v642_v43 = vadd.f32 %v641_v39, %v3632_v42  ;;  %v643_v44 = vpop.f32.mrb[26].mxu0  ;;  %1406 = vmatprep.mubr.bf16.mxu0 %v819_v35  ;;  %1622 = vmatprep.mubr.bf16.mxu1 %v819_v35 }
 0x1ae   : > { %v644_v45 = vadd.f32 %v643_v44, %v3628_v41  ;;  %v645_v46 = vpop.f32.mrb[27].mxu0  ;;  %1407 = vmatmul.mubr.bf16.gmra.mrb[52].mxu0 %v818_v34  ;;  %1623 = vmatmul.mubr.bf16.gmra.mrb[36].mxu1 %v818_v34  ;;  %v791_v48 = vmax.f32 %v640_v36, 0.0 }
 0x1af   : > { %v646_v47 = vadd.f32 %v645_v46, %v3632_v42  ;;  %v792_v51 = vmax.f32 %v642_v43, 0.0 }
 0x1b0   : > { %v794_v50 = vmax.f32 %v644_v45, 0.0 }
 0x1b1   : > { %v795_v53 = vmax.f32 %v646_v47, 0.0 }
 0x1b2   : > { %v821_v54 = vpack.c.bf16 %v794_v50, %v791_v48 }
 0x1b3   : > { %v822_v55 = vpack.c.bf16 %v795_v53, %v792_v51  ;;  %v649_v57 = vpop.f32.mrb[28].mxu0 }
 0x1b4   : > { %v650_v58 = vadd.f32 %v649_v57, %v3628_v41  ;;  %v651_v59 = vpop.f32.mrb[29].mxu0 }
 0x1b5   : > { %v652_v60 = vadd.f32 %v651_v59, %v3632_v42  ;;  %v653_v61 = vpop.f32.mrb[30].mxu0  ;;  %1416 = vmatprep.mubr.bf16.mxu0 %v822_v55  ;;  %1630 = vmatprep.mubr.bf16.mxu1 %v822_v55 }
 0x1b6   : > { %v654_v63 = vadd.f32 %v653_v61, %v3628_v41  ;;  %v655_v1 = vpop.f32.mrb[31].mxu0  ;;  %1417 = vmatmul.mubr.bf16.gmra.mrb[56].mxu0 %v821_v54  ;;  %1631 = vmatmul.mubr.bf16.gmra.mrb[40].mxu1 %v821_v54  ;;  %v797_v4 = vmax.f32 %v650_v58, 0.0  ;;  %v3082_v41 = vld [vmem:[#allocation8 + $0x40] sm:$0xff]  }
 0x1b7   : > { %v656_v3 = vadd.f32 %v655_v1, %v3632_v42  ;;  %v798_v7 = vmax.f32 %v652_v60, 0.0  ;;  %v3727_v42 = vld [vmem:[#allocation8 + $0x80] sm:$0xff]   ;;  %2612 = vmatprep.subr.bf16.mxu1 %v3082_v41 }
 0x1b8   : > { %v800_v6 = vmax.f32 %v654_v63, 0.0  ;;  %2756 = vmatprep.subr.bf16.mxu0 %v3727_v42 }
 0x1b9   : > { %v801_v8 = vmax.f32 %v656_v3, 0.0 }
 0x1ba   : > { %v824_v9 = vpack.c.bf16 %v800_v6, %v797_v4  ;;  %v923_v4 = vld [vmem:[%s3985_s4] sm:$0x7] }
 0x1bb   : > { %v825_v10 = vpack.c.bf16 %v801_v8, %v798_v7 }
 0x1bd   : > { %1426 = vmatprep.mubr.bf16.mxu0 %v825_v10  ;;  %1638 = vmatprep.mubr.bf16.mxu1 %v825_v10  ;;  %v3779_v10 = vrot.slane %v923_v4, %v412_v56 }
 0x1be   : > { %1427 = vmatmul.mubr.bf16.gmra.mrb[60].mxu0 %v824_v9  ;;  %1639 = vmatmul.mubr.bf16.gmra.mrb[44].mxu1 %v824_v9 }
 0x1bf   : > { %2740 = vmatprep.mubr.bf16.mxu1 %v3657_v52  ;;  %1469 = vmatprep.mubr.bf16.mxu0 %v3338_v0 }
 0x1c6   : > { %1470 = vmatmul.mubr.bf16.vlgmr.msra.gmra.mrb[32].mxu0 %v3657_v52  ;;  %2741 = vmatmul.mubr.bf16.vlgmr.msra.gmra.mrb[48].mxu1 %v3655_v49  ;;  %v3085_v52 = vld [vmem:[#allocation8 + $0x48] sm:$0xff]  }
 0x1c7   : > { %1479 = vmatprep.mubr.bf16.mxu0 %v3338_v0  ;;  %2744 = vmatprep.mubr.bf16.mxu1 %v3669_v25 }
 0x1c8   : > { %2757 = vmatpush3.bf16.msra.mxu0 %v3727_v42 }
 0x1ce   : > { %1480 = vmatmul.mubr.bf16.gmra.mrb[36].mxu0 %v3655_v49  ;;  %2745 = vmatmul.mubr.bf16.gmra.mrb[52].mxu1 %v3667_v22  ;;  %v3083_v49 = vld [vmem:[#allocation8] sm:$0xff]  }
 0x1cf   : > { %1489 = vmatprep.mubr.bf16.mxu0 %v3338_v0  ;;  %2748 = vmatprep.mubr.bf16.mxu1 %v3681_v2 }
 0x1d0   : > { %2613 = vmatpush3.bf16.msra.mxu1 %v3083_v49 }
 0x1d1   : > { %2614 = vmatprep.subr.bf16.mxu1 %v3085_v52 }
 0x1d6   : > { %1490 = vmatmul.mubr.bf16.gmra.mrb[40].mxu0 %v3669_v25  ;;  %2749 = vmatmul.mubr.bf16.gmra.mrb[56].mxu1 %v3679_v62  ;;  %v3731_v25 = vld [vmem:[#allocation8 + $0x88] sm:$0xff]  }
 0x1d7   : > { %1499 = vmatprep.mubr.bf16.mxu0 %v3338_v0  ;;  %2752 = vmatprep.mubr.bf16.mxu1 %v3693_v33 }
 0x1d8   : > { %2758 = vmatprep.subr.bf16.mxu0 %v3731_v25 }
 0x1d9   : > { %2759 = vmatpush3.bf16.msra.mxu0 %v3731_v25 }
 0x1de   : > { %1500 = vmatmul.mubr.bf16.gmra.mrb[44].mxu0 %v3667_v22  ;;  %2753 = vmatmul.mubr.bf16.gmra.mrb[60].mxu1 %v3691_v30  ;;  %v3086_v22 = vld [vmem:[#allocation8 + $0x8] sm:$0xff]  }
 0x1df   : > { %1509 = vmatprep.mubr.bf16.mxu0 %v3338_v0  ;;  %2615 = vmatpush3.bf16.msra.mxu1 %v3086_v22 }
 0x1e6   : > { %1510 = vmatmul.mubr.bf16.gmra.mrb[48].mxu0 %v3681_v2  ;;  %v3089_v2 = vld [vmem:[#allocation8 + $0x10] sm:$0xff]  }
 0x1e7   : > { %1519 = vmatprep.mubr.bf16.mxu0 %v3338_v0 }
 0x1ee   : > { %1520 = vmatmul.mubr.bf16.gmra.mrb[52].mxu0 %v3679_v62  ;;  %v3735_v62 = vld [vmem:[#allocation8 + $0x90] sm:$0xff]  }
 0x1ef   : > { %1529 = vmatprep.mubr.bf16.mxu0 %v3338_v0  ;;  %2760 = vmatprep.subr.bf16.mxu0 %v3735_v62 }
 0x1f0   : > { %2761 = vmatpush3.bf16.msra.mxu0 %v3735_v62 }
 0x1f1   : > { %2762 = vmatprep.subr.bf16.mxu0 %v3739_v13 }
 0x1f4   : > { %2763 = vmatpush3.bf16.msra.mxu0 %v3739_v13 }
 0x1f5   : > { %2764 = vmatprep.subr.bf16.mxu0 %v3743_v15 }
 0x1f6   : > { %1530 = vmatmul.mubr.bf16.gmra.mrb[56].mxu0 %v3693_v33 }
 0x1f7   : > { %1539 = vmatprep.mubr.bf16.mxu0 %v3338_v0  ;;  %v3088_v0 = vld [vmem:[#allocation8 + $0x50] sm:$0xff]  }
 0x1f8   : > { %2616 = vmatprep.subr.bf16.mxu1 %v3088_v0  ;;  %2765 = vmatpush3.bf16.msra.mxu0 %v3743_v15 }
 0x1f9   : > { %2617 = vmatpush3.bf16.msra.mxu1 %v3089_v2  ;;  %2766 = vmatprep.subr.bf16.mxu0 %v3747_v19 }
 0x1fa   : > { %2618 = vmatprep.subr.bf16.mxu1 %v3091_v11 }
 0x1fc   : > { %2767 = vmatpush3.bf16.msra.mxu0 %v3747_v19 }
 0x1fd   : > { %2619 = vmatpush3.bf16.msra.mxu1 %v3092_v12  ;;  %2768 = vmatprep.subr.bf16.mxu0 %v3751_v21 }
 0x1fe   : > { %1540 = vmatmul.mubr.bf16.gmra.mrb[60].mxu0 %v3691_v30  ;;  %2620 = vmatprep.subr.bf16.mxu1 %v3094_v14 }
 0x200   : > { %2769 = vmatpush3.bf16.msra.mxu0 %v3751_v21 }
 0x201   : > { %2621 = vmatpush3.bf16.msra.mxu1 %v3095_v16  ;;  %2770 = vmatprep.subr.bf16.mxu0 %v3755_v26 }
 0x202   : > { %2622 = vmatprep.subr.bf16.mxu1 %v3097_v17 }
 0x204   : > { %2771 = vmatpush3.bf16.msra.mxu0 %v3755_v26 }
 0x205   : > { %2623 = vmatpush3.bf16.msra.mxu1 %v3098_v18 }
 0x206   : > { %2624 = vmatprep.subr.bf16.mxu1 %v3100_v20 }
 0x209   : > { %2625 = vmatpush3.bf16.msra.mxu1 %v3101_v23 }
 0x20a   : > { %2626 = vmatprep.subr.bf16.mxu1 %v3103_v24 }
 0x20d   : > { %2627 = vmatpush3.bf16.msra.mxu1 %v3104_v27 }
 0x20e   : > { %2788 = vmatprep.subr.bf16.mxu1 %v3727_v42 }
 0x259   : > { %v2548_v28 = vpop.f32.mrb[16].mxu1 }
 0x25a   : > { %v2549_v29 = vpop.f32.mrb[17].mxu1 }
 0x25b   : > { %v2550_v30 = vadd.f32 %v2549_v29, %v2548_v28  ;;  %v2551_v31 = vpop.f32.mrb[18].mxu1 }
 0x25c   : > { %v2552_v32 = vpop.f32.mrb[19].mxu1 }
 0x25d   : > { %v3760_v33 = vadd.f32 %v2552_v32, %v2551_v31  ;;  %v3798_v31 = vrot.slane %v923_v4, %v404_v38  ;;  %v3802_v32 = vrot.slane %v923_v4, %v408_v40 }
 0x261   : > { %v2554_v34 = vpop.f32.mrb[20].mxu1 }
 0x262   : > { %v2555_v35 = vpop.f32.mrb[21].mxu1 }
 0x263   : > { %v2556_v5 = vadd.f32 %v2555_v35, %v2554_v34  ;;  %v2557_v36 = vpop.f32.mrb[22].mxu1 }
 0x264   : > { %v2558_v39 = vpop.f32.mrb[23].mxu1 }
 0x265   : > { %v2559_v43 = vadd.f32 %v2558_v39, %v2557_v36  ;;  %v1593_v35 = vadd.f32 %v2556_v5, %v3779_v10 }
 0x267   : > { %v1596_v38 = vadd.f32 %v2559_v43, %v3779_v10 }
 0x269   : > { %v2560_v44 = vpop.f32.mrb[24].mxu1 }
 0x26a   : > { %v2561_v45 = vpop.f32.mrb[25].mxu1 }
 0x26b   : > { %v3762_v46 = vadd.f32 %v2561_v45, %v2560_v44  ;;  %v2563_v47 = vpop.f32.mrb[26].mxu1  ;;  %v1585_v44 = vadd.f32 %v2550_v30, %v3779_v10 }
 0x26c   : > { %v2564_v48 = vpop.f32.mrb[27].mxu1 }
 0x26d   : > { %v3764_v50 = vadd.f32 %v2564_v48, %v2563_v47 }
 0x271   : > { %v2566_v51 = vpop.f32.mrb[28].mxu1 }
 0x272   : > { %v2567_v53 = vpop.f32.mrb[29].mxu1 }
 0x273   : > { %v3766_v54 = vadd.f32 %v2567_v53, %v2566_v51  ;;  %v2569_v55 = vpop.f32.mrb[30].mxu1 }
 0x274   : > { %v2570_v57 = vpop.f32.mrb[31].mxu1 }
 0x275   : > { %v3768_v58 = vadd.f32 %v2570_v57, %v2569_v55  ;;  %v1588_v57 = vadd.f32 %v3760_v33, %v3779_v10  ;;  %v1609_v33 = vadd.f32 %v3766_v54, %v3779_v10 }
 0x279   : > { %v2572_v59 = vpop.f32.mrb[32].mxu1 }
 0x27a   : > { %v2573_v60 = vpop.f32.mrb[33].mxu1 }
 0x27b   : > { %v3770_v61 = vadd.f32 %v2573_v60, %v2572_v59  ;;  %v2575_v63 = vpop.f32.mrb[34].mxu1 }
 0x27c   : > { %v2576_v1 = vpop.f32.mrb[35].mxu1 }
 0x27d   : > { %v3772_v3 = vadd.f32 %v2576_v1, %v2575_v63 }
 0x281   : > { %v2578_v6 = vpop.f32.mrb[36].mxu1 }
 0x282   : > { %v2579_v7 = vpop.f32.mrb[37].mxu1 }
 0x283   : > { %v2580_v8 = vadd.f32 %v2579_v7, %v2578_v6  ;;  %v2581_v9 = vpop.f32.mrb[38].mxu1 }
 0x284   : > { %v2582_v41 = vpop.f32.mrb[39].mxu1 }
 0x285   : > { %v2583_v49 = vadd.f32 %v2582_v41, %v2581_v9  ;;  %v3782_v52 = vadd.f32 %v2580_v8, %v3779_v10 }
 0x287   : > { %v3785_v22 = vadd.f32 %v2583_v49, %v3779_v10 }
 0x289   : > { %v2584_v0 = vpop.f32.mrb[40].mxu1 }
 0x28a   : > { %v2585_v2 = vpop.f32.mrb[41].mxu1 }
 0x28b   : > { %v2586_v11 = vadd.f32 %v2585_v2, %v2584_v0  ;;  %v2587_v12 = vpop.f32.mrb[42].mxu1 }
 0x28c   : > { %v2588_v14 = vpop.f32.mrb[43].mxu1 }
 0x28d   : > { %v2589_v16 = vadd.f32 %v2588_v14, %v2587_v12  ;;  %v3788_v17 = vadd.f32 %v2586_v11, %v3779_v10 }
 0x28f   : > { %v3791_v56 = vadd.f32 %v2589_v16, %v3779_v10 }
 0x291   : > { %v2590_v18 = vpop.f32.mrb[44].mxu1 }
 0x292   : > { %v2591_v20 = vpop.f32.mrb[45].mxu1 }
 0x293   : > { %v2592_v23 = vadd.f32 %v2591_v20, %v2590_v18  ;;  %v2593_v24 = vpop.f32.mrb[46].mxu1  ;;  %v1601_v18 = vadd.f32 %v3762_v46, %v3779_v10 }
 0x294   : > { %v2594_v27 = vpop.f32.mrb[47].mxu1 }
 0x295   : > { %v2595_v28 = vadd.f32 %v2594_v27, %v2593_v24  ;;  %v3794_v29 = vadd.f32 %v2592_v23, %v3779_v10 }
 0x297   : > { %v3805_v34 = vadd.f32 %v2595_v28, %v3779_v10  ;;  %v1612_v28 = vadd.f32 %v3768_v58, %v3779_v10 }
 0x299   : > { %v1471_v36 = vpop.f32.mrb[32].mxu0  ;;  %v2742_v39 = vpop.f32.mrb[48].mxu1 }
 0x29a   : > { %v2804_v45 = vadd.f32 %v1471_v36, %v3798_v31  ;;  %v1690_v47 = vadd.f32 %v2742_v39, %v1593_v35  ;;  %v1473_v48 = vpop.f32.mrb[33].mxu0  ;;  %v1681_v51 = vpop.f32.mrb[49].mxu1 }
 0x29b   : > { %v2805_v37 = vadd.f32 %v1473_v48, %v3802_v32  ;;  %v1682_v40 = vadd.f32 %v1681_v51, %v1585_v44  ;;  %v1475_v53 = vpop.f32.mrb[34].mxu0  ;;  %v2743_v55 = vpop.f32.mrb[50].mxu1  ;;  %v1604_v44 = vadd.f32 %v3764_v50, %v3779_v10 }
 0x29c   : > { %v2806_v5 = vadd.f32 %v1475_v53, %v3798_v31  ;;  %v1693_v59 = vadd.f32 %v2743_v55, %v1596_v38  ;;  %v1477_v60 = vpop.f32.mrb[35].mxu0  ;;  %v1684_v30 = vpop.f32.mrb[51].mxu1  ;;  %v1744_v4 = vmax.f32 %v2804_v45, 0.0  ;;  %v1752_v6 = vmax.f32 %v1690_v47, 0.0 }
 0x29d   : > { %v2807_v63 = vadd.f32 %v1477_v60, %v3802_v32  ;;  %v1685_v1 = vadd.f32 %v1684_v30, %v1588_v57  ;;  %v1745_v8 = vmax.f32 %v2805_v37, 0.0  ;;  %v1746_v9 = vmax.f32 %v1682_v40, 0.0 }
 0x29e   : > { %v1747_v7 = vmax.f32 %v2806_v5, 0.0  ;;  %v1755_v43 = vmax.f32 %v1693_v59, 0.0 }
 0x29f   : > { %v1748_v41 = vmax.f32 %v2807_v63, 0.0  ;;  %v1749_v49 = vmax.f32 %v1685_v1, 0.0 }
 0x2a0   : > { %v1792_v0 = vpack.c.bf16 %v1747_v7, %v1744_v4  ;;  %v1797_v2 = vpack.c.bf16 %v1755_v43, %v1752_v6  ;;  %v1617_v6 = vadd.f32 %v3770_v61, %v3779_v10  ;;  %v1620_v61 = vadd.f32 %v3772_v3, %v3779_v10 }
 0x2a1   : > { %v1793_v11 = vpack.c.bf16 %v1748_v41, %v1745_v8  ;;  %v1794_v12 = vpack.c.bf16 %v1749_v49, %v1746_v9  ;;  %v1481_v14 = vpop.f32.mrb[36].mxu0  ;;  %v2746_v16 = vpop.f32.mrb[52].mxu1 }
 0x2a2   : > { %v2808_v20 = vadd.f32 %v1481_v14, %v3798_v31  ;;  %v1706_v23 = vadd.f32 %v2746_v16, %v1609_v33  ;;  %v1483_v24 = vpop.f32.mrb[37].mxu0  ;;  %v1697_v27 = vpop.f32.mrb[53].mxu1 }
 0x2a3   : > { %v2809_v35 = vadd.f32 %v1483_v24, %v3802_v32  ;;  %v1698_v36 = vadd.f32 %v1697_v27, %v1601_v18  ;;  %v1485_v39 = vpop.f32.mrb[38].mxu0  ;;  %v2747_v54 = vpop.f32.mrb[54].mxu1  ;;  %2047 = vmatprep.mubr.bf16.mxu1 %v1793_v11  ;;  %2772 = vmatprep.mubr.bf16.mxu0 %v1794_v12 }
 0x2a4   : > { %v2810_v46 = vadd.f32 %v1485_v39, %v3798_v31  ;;  %v1709_v45 = vadd.f32 %v2747_v54, %v1612_v28  ;;  %v1487_v47 = vpop.f32.mrb[39].mxu0  ;;  %v1700_v48 = vpop.f32.mrb[55].mxu1  ;;  %2048 = vmatmul.mubr.bf16.vlgmr.msra.gmra.mrb[64].mxu1 %v1792_v0  ;;  %2773 = vmatmul.mubr.bf16.vlgmr.msra.gmra.mrb[64].mxu0 %v1797_v2  ;;  %v1750_v38 = vmax.f32 %v2808_v20, 0.0  ;;  %v1764_v37 = vmax.f32 %v1706_v23, 0.0 }
 0x2a5   : > { %v2811_v51 = vadd.f32 %v1487_v47, %v3802_v32  ;;  %v1701_v58 = vadd.f32 %v1700_v48, %v1604_v44  ;;  %2796 = vmatpush3.bf16.msra.mxu1 %v3727_v42  ;;  %v1751_v55 = vmax.f32 %v2809_v35, 0.0  ;;  %v1758_v50 = vmax.f32 %v1698_v36, 0.0 }
 0x2a6   : > { %v1753_v40 = vmax.f32 %v2810_v46, 0.0  ;;  %v1767_v53 = vmax.f32 %v1709_v45, 0.0  ;;  %2789 = vmatprep.subr.bf16.mxu1 %v3731_v25 }
 0x2a7   : > { %v1754_v57 = vmax.f32 %v2811_v51, 0.0  ;;  %v1761_v5 = vmax.f32 %v1701_v58, 0.0 }
 0x2a8   : > { %v1795_v59 = vpack.c.bf16 %v1753_v40, %v1750_v38  ;;  %v1803_v60 = vpack.c.bf16 %v1767_v53, %v1764_v37 }
 0x2a9   : > { %v1796_v30 = vpack.c.bf16 %v1754_v57, %v1751_v55  ;;  %v1800_v63 = vpack.c.bf16 %v1761_v5, %v1758_v50  ;;  %v1491_v1 = vpop.f32.mrb[40].mxu0  ;;  %v2750_v4 = vpop.f32.mrb[56].mxu1  ;;  %2797 = vmatpush3.bf16.msra.mxu1 %v3731_v25 }
 0x2aa   : > { %v2812_v42 = vadd.f32 %v1491_v1, %v3798_v31  ;;  %v1722_v7 = vadd.f32 %v2750_v4, %v3782_v52  ;;  %v1493_v43 = vpop.f32.mrb[41].mxu0  ;;  %v1713_v8 = vpop.f32.mrb[57].mxu1  ;;  %2790 = vmatprep.subr.bf16.mxu1 %v3735_v62 }
 0x2ab   : > { %v2813_v9 = vadd.f32 %v1493_v43, %v3802_v32  ;;  %v1714_v41 = vadd.f32 %v1713_v8, %v1617_v6  ;;  %v1495_v49 = vpop.f32.mrb[42].mxu0  ;;  %v2751_v0 = vpop.f32.mrb[58].mxu1  ;;  %2055 = vmatprep.mubr.bf16.mxu1 %v1796_v30  ;;  %2776 = vmatprep.mubr.bf16.mxu0 %v1800_v63 }
 0x2ac   : > { %v2814_v25 = vadd.f32 %v1495_v49, %v3798_v31  ;;  %v1725_v2 = vadd.f32 %v2751_v0, %v3785_v22  ;;  %v1497_v33 = vpop.f32.mrb[43].mxu0  ;;  %v1716_v52 = vpop.f32.mrb[59].mxu1  ;;  %2056 = vmatmul.mubr.bf16.gmra.mrb[68].mxu1 %v1795_v59  ;;  %2777 = vmatmul.mubr.bf16.gmra.mrb[68].mxu0 %v1803_v60  ;;  %v1756_v14 = vmax.f32 %v2812_v42, 0.0  ;;  %v1776_v16 = vmax.f32 %v1722_v7, 0.0 }
 0x2ad   : > { %v2815_v11 = vadd.f32 %v1497_v33, %v3802_v32  ;;  %v1717_v12 = vadd.f32 %v1716_v52, %v1620_v61  ;;  %2798 = vmatpush3.bf16.msra.mxu1 %v3735_v62  ;;  %v1757_v3 = vmax.f32 %v2813_v9, 0.0  ;;  %v1770_v10 = vmax.f32 %v1714_v41, 0.0 }
 0x2ae   : > { %v1759_v18 = vmax.f32 %v2814_v25, 0.0  ;;  %v1779_v20 = vmax.f32 %v1725_v2, 0.0  ;;  %2791 = vmatprep.subr.bf16.mxu1 %v3739_v13 }
 0x2af   : > { %v1760_v23 = vmax.f32 %v2815_v11, 0.0  ;;  %v1773_v24 = vmax.f32 %v1717_v12, 0.0 }
 0x2b0   : > { %v1798_v22 = vpack.c.bf16 %v1759_v18, %v1756_v14  ;;  %v3844_v27 = vpack.c.bf16 %v1779_v20, %v1776_v16 }
 0x2b1   : > { %v1799_v28 = vpack.c.bf16 %v1760_v23, %v1757_v3  ;;  %v3846_v35 = vpack.c.bf16 %v1773_v24, %v1770_v10  ;;  %v1501_v36 = vpop.f32.mrb[44].mxu0  ;;  %v2754_v39 = vpop.f32.mrb[60].mxu1  ;;  %2799 = vmatpush3.bf16.msra.mxu1 %v3739_v13 }
 0x2b2   : > { %v2816_v62 = vadd.f32 %v1501_v36, %v3798_v31  ;;  %v1738_v54 = vadd.f32 %v2754_v39, %v3794_v29  ;;  %v1503_v44 = vpop.f32.mrb[45].mxu0  ;;  %v1729_v46 = vpop.f32.mrb[61].mxu1  ;;  %2792 = vmatprep.subr.bf16.mxu1 %v3743_v15 }
 0x2b3   : > { %v2817_v45 = vadd.f32 %v1503_v44, %v3802_v32  ;;  %v1730_v47 = vadd.f32 %v1729_v46, %v3788_v17  ;;  %v1505_v48 = vpop.f32.mrb[46].mxu0  ;;  %v2755_v51 = vpop.f32.mrb[62].mxu1  ;;  %2063 = vmatprep.mubr.bf16.mxu1 %v1799_v28 }
 0x2b4   : > { %v2818_v58 = vadd.f32 %v1505_v48, %v3798_v31  ;;  %v1741_v38 = vadd.f32 %v2755_v51, %v3805_v34  ;;  %v1507_v13 = vpop.f32.mrb[47].mxu0  ;;  %v1732_v37 = vpop.f32.mrb[63].mxu1  ;;  %2064 = vmatmul.mubr.bf16.gmra.mrb[72].mxu1 %v1798_v22  ;;  %v1762_v53 = vmax.f32 %v2816_v62, 0.0  ;;  %v1788_v55 = vmax.f32 %v1738_v54, 0.0 }
 0x2b5   : > { %v2819_v29 = vadd.f32 %v1507_v13, %v3802_v32  ;;  %v1733_v40 = vadd.f32 %v1732_v37, %v3791_v56  ;;  %2800 = vmatpush3.bf16.msra.mxu1 %v3743_v15  ;;  %v1763_v57 = vmax.f32 %v2817_v45, 0.0  ;;  %v1782_v5 = vmax.f32 %v1730_v47, 0.0 }
 0x2b6   : > { %v1765_v50 = vmax.f32 %v2818_v58, 0.0  ;;  %v1791_v17 = vmax.f32 %v1741_v38, 0.0  ;;  %2793 = vmatprep.subr.bf16.mxu1 %v3747_v19 }
 0x2b7   : > { %v1766_v59 = vmax.f32 %v2819_v29, 0.0  ;;  %v1785_v60 = vmax.f32 %v1733_v40, 0.0 }
 0x2b8   : > { %v1801_v34 = vpack.c.bf16 %v1765_v50, %v1762_v53  ;;  %v3860_v30 = vpack.c.bf16 %v1791_v17, %v1788_v55 }
 0x2b9   : > { %v1802_v63 = vpack.c.bf16 %v1766_v59, %v1763_v57  ;;  %v3862_v1 = vpack.c.bf16 %v1785_v60, %v1782_v5  ;;  %v1511_v4 = vpop.f32.mrb[48].mxu0  ;;  %2801 = vmatpush3.bf16.msra.mxu1 %v3747_v19 }
 0x2ba   : > { %v2820_v15 = vadd.f32 %v1511_v4, %v3798_v31  ;;  %v1513_v56 = vpop.f32.mrb[49].mxu0  ;;  %2794 = vmatprep.subr.bf16.mxu1 %v3751_v21 }
 0x2bb   : > { %v2821_v6 = vadd.f32 %v1513_v56, %v3802_v32  ;;  %v1515_v42 = vpop.f32.mrb[50].mxu0  ;;  %2071 = vmatprep.mubr.bf16.mxu1 %v1802_v63 }
 0x2bc   : > { %v2822_v7 = vadd.f32 %v1515_v42, %v3798_v31  ;;  %v1517_v43 = vpop.f32.mrb[51].mxu0  ;;  %2072 = vmatmul.mubr.bf16.gmra.mrb[76].mxu1 %v1801_v34  ;;  %v1768_v9 = vmax.f32 %v2820_v15, 0.0 }
 0x2bd   : > { %v2823_v8 = vadd.f32 %v1517_v43, %v3802_v32  ;;  %2802 = vmatpush3.bf16.msra.mxu1 %v3751_v21  ;;  %v1769_v19 = vmax.f32 %v2821_v6, 0.0 }
 0x2be   : > { %v1771_v41 = vmax.f32 %v2822_v7, 0.0  ;;  %2795 = vmatprep.subr.bf16.mxu1 %v3755_v26 }
 0x2bf   : > { %v1772_v49 = vmax.f32 %v2823_v8, 0.0 }
 0x2c0   : > { %v1804_v0 = vpack.c.bf16 %v1771_v41, %v1768_v9 }
 0x2c1   : > { %v1805_v61 = vpack.c.bf16 %v1772_v49, %v1769_v19  ;;  %v1521_v25 = vpop.f32.mrb[52].mxu0  ;;  %2803 = vmatpush3.bf16.msra.mxu1 %v3755_v26 }
 0x2c2   : > { %v2824_v2 = vadd.f32 %v1521_v25, %v3798_v31  ;;  %v1523_v33 = vpop.f32.mrb[53].mxu0 }
 0x2c3   : > { %v2825_v52 = vadd.f32 %v1523_v33, %v3802_v32  ;;  %v1525_v11 = vpop.f32.mrb[54].mxu0  ;;  %2079 = vmatprep.mubr.bf16.mxu1 %v1805_v61 }
 0x2c4   : > { %v2826_v21 = vadd.f32 %v1525_v11, %v3798_v31  ;;  %v1527_v12 = vpop.f32.mrb[55].mxu0  ;;  %2080 = vmatmul.mubr.bf16.gmra.mrb[80].mxu1 %v1804_v0  ;;  %v1774_v16 = vmax.f32 %v2824_v2, 0.0 }
 0x2c5   : > { %v2827_v14 = vadd.f32 %v1527_v12, %v3802_v32  ;;  %v1775_v20 = vmax.f32 %v2825_v52, 0.0 }
 0x2c6   : > { %v1777_v18 = vmax.f32 %v2826_v21, 0.0 }
 0x2c7   : > { %v1778_v3 = vmax.f32 %v2827_v14, 0.0 }
 0x2c8   : > { %v1807_v10 = vpack.c.bf16 %v1777_v18, %v1774_v16 }
 0x2c9   : > { %v1808_v23 = vpack.c.bf16 %v1778_v3, %v1775_v20  ;;  %v1531_v26 = vpop.f32.mrb[56].mxu0 }
 0x2ca   : > { %v2828_v24 = vadd.f32 %v1531_v26, %v3798_v31  ;;  %v1533_v22 = vpop.f32.mrb[57].mxu0 }
 0x2cb   : > { %v2829_v28 = vadd.f32 %v1533_v22, %v3802_v32  ;;  %v1535_v36 = vpop.f32.mrb[58].mxu0  ;;  %2087 = vmatprep.mubr.bf16.mxu1 %v1808_v23 }
 0x2cc   : > { %v2830_v39 = vadd.f32 %v1535_v36, %v3798_v31  ;;  %v1537_v62 = vpop.f32.mrb[59].mxu0  ;;  %2088 = vmatmul.mubr.bf16.gmra.mrb[84].mxu1 %v1807_v10  ;;  %v1780_v44 = vmax.f32 %v2828_v24, 0.0 }
 0x2cd   : > { %v2831_v54 = vadd.f32 %v1537_v62, %v3802_v32  ;;  %v1781_v45 = vmax.f32 %v2829_v28, 0.0 }
 0x2ce   : > { %v1783_v46 = vmax.f32 %v2830_v39, 0.0 }
 0x2cf   : > { %v1784_v47 = vmax.f32 %v2831_v54, 0.0 }
 0x2d0   : > { %v1810_v48 = vpack.c.bf16 %v1783_v46, %v1780_v44 }
 0x2d1   : > { %v1811_v51 = vpack.c.bf16 %v1784_v47, %v1781_v45  ;;  %v1541_v58 = vpop.f32.mrb[60].mxu0 }
 0x2d2   : > { %v2832_v38 = vadd.f32 %v1541_v58, %v3798_v31  ;;  %v1543_v13 = vpop.f32.mrb[61].mxu0 }
 0x2d3   : > { %v2833_v37 = vadd.f32 %v1543_v13, %v3802_v32  ;;  %v1545_v29 = vpop.f32.mrb[62].mxu0  ;;  %2095 = vmatprep.mubr.bf16.mxu1 %v1811_v51 }
 0x2d4   : > { %v2834_v40 = vadd.f32 %v1545_v29, %v3798_v31  ;;  %v1547_v53 = vpop.f32.mrb[63].mxu0  ;;  %2096 = vmatmul.mubr.bf16.gmra.mrb[88].mxu1 %v1810_v48  ;;  %v1786_v50 = vmax.f32 %v2832_v38, 0.0 }
 0x2d5   : > { %v2835_v55 = vadd.f32 %v1547_v53, %v3802_v32  ;;  %v1787_v57 = vmax.f32 %v2833_v37, 0.0  ;;  %v3892_v32 = vld [vmem:[%s3987_s6] ss:$0 sm:$0xff] }
 0x2d6   : > { %v1789_v17 = vmax.f32 %v2834_v40, 0.0 }
 0x2d7   : > { %v1790_v5 = vmax.f32 %v2835_v55, 0.0 }
 0x2d8   : > { %v1813_v59 = vpack.c.bf16 %v1789_v17, %v1786_v50 }
 0x2d9   : > { %v1814_v60 = vpack.c.bf16 %v1790_v5, %v1787_v57 }
 0x2db   : > { %2103 = vmatprep.mubr.bf16.mxu1 %v1814_v60 }
 0x2dc   : > { %2104 = vmatmul.mubr.bf16.gmra.mrb[92].mxu1 %v1813_v59 }
 0x2dd   : > { %2780 = vmatprep.mubr.bf16.mxu1 %v3846_v35 }
 0x2e4   : > { %2781 = vmatmul.mubr.bf16.vlgmr.msra.gmra.mrb[96].mxu1 %v3844_v27 }
 0x2e5   : > { %2784 = vmatprep.mubr.bf16.mxu1 %v3862_v1 }
 0x2ec   : > { %2785 = vmatmul.mubr.bf16.gmra.mrb[100].mxu1 %v3860_v30 }
 0x377   : > { %v2628_v31 = vpop.f32.mrb[64].mxu1  ;;  %v2774_v34 = vpop.f32.mrb[64].mxu0 }
 0x378   : > { %v2629_v63 = vpop.f32.mrb[65].mxu1  ;;  %v2146_v4 = vpop.f32.mrb[65].mxu0 }
 0x379   : > { %v2630_v15 = vadd.f32 %v2629_v63, %v2628_v31  ;;  %v2631_v56 = vpop.f32.mrb[66].mxu1  ;;  %v2775_v6 = vpop.f32.mrb[66].mxu0 }
 0x37a   : > { %v2632_v42 = vpop.f32.mrb[67].mxu1  ;;  %v2149_v35 = vpop.f32.mrb[67].mxu0 }
 0x37b   : > { %v2050_v27 = vadd.f32 %v2630_v15, %v3892_v32  ;;  %v2633_v7 = vadd.f32 %v2632_v42, %v2631_v56 }
 0x37d   : > { %v2147_v1 = vadd.f32 %v2146_v4, %v2050_v27  ;;  %v2053_v30 = vadd.f32 %v2633_v7, %v3892_v32 }
 0x37f   : > { %3106 = vtanh.f32 %v2147_v1  ;;  %v2150_v43 = vadd.f32 %v2149_v35, %v2053_v30  ;;  %v2634_v8 = vpop.f32.mrb[68].mxu1  ;;  %v2778_v9 = vpop.f32.mrb[68].mxu0 }
 0x380   : > { %v2635_v41 = vpop.f32.mrb[69].mxu1  ;;  %v2162_v19 = vpop.f32.mrb[69].mxu0 }
 0x381   : > { %3108 = vtanh.f32 %v2150_v43  ;;  %v2636_v49 = vadd.f32 %v2635_v41, %v2634_v8  ;;  %v2637_v0 = vpop.f32.mrb[70].mxu1  ;;  %v2779_v61 = vpop.f32.mrb[70].mxu0 }
 0x382   : > { %v2638_v25 = vpop.f32.mrb[71].mxu1  ;;  %v2165_v2 = vpop.f32.mrb[71].mxu0 }
 0x383   : > { %v2058_v33 = vadd.f32 %v2636_v49, %v3892_v32  ;;  %v2639_v52 = vadd.f32 %v2638_v25, %v2637_v0 }
 0x385   : > { %v2155_v11 = vadd.f32 %v2774_v34, %v2058_v33  ;;  %v2061_v21 = vadd.f32 %v2639_v52, %v3892_v32 }
 0x387   : > { %3110 = vtanh.f32 %v2155_v11  ;;  %v2158_v12 = vadd.f32 %v2775_v6, %v2061_v21  ;;  %v2640_v14 = vpop.f32.mrb[72].mxu1 }
 0x388   : > { %v2641_v16 = vpop.f32.mrb[73].mxu1 }
 0x389   : > { %v3107_v18 = vpop.eup %3106  ;;  %3112 = vtanh.f32 %v2158_v12  ;;  %v2642_v20 = vadd.f32 %v2641_v16, %v2640_v14  ;;  %v2643_v3 = vpop.f32.mrb[74].mxu1 }
 0x38a   : > { %v2225_v10 = vmul.f32 2.0, %v3107_v18  ;;  %v2644_v23 = vpop.f32.mrb[75].mxu1 }
 0x38b   : > { %v3109_v26 = vpop.eup %3108  ;;  %v2066_v24 = vadd.f32 %v2642_v20, %v3892_v32  ;;  %v2645_v22 = vadd.f32 %v2644_v23, %v2643_v3 }
 0x38c   : > { %2241 = vst [vmem:[%s3901_s29] sm:$0xff] %v2225_v10  ;;  %v2226_v28 = vmul.f32 2.0, %v3109_v26 }
 0x38d   : > { %v2163_v36 = vadd.f32 %v2162_v19, %v2066_v24  ;;  %v2069_v39 = vadd.f32 %v2645_v22, %v3892_v32 }
 0x38e   : > { %2242 = vst [vmem:[%s3901_s29 + $0x8] sm:$0xff] %v2226_v28 }
 0x38f   : > { %3114 = vtanh.f32 %v2163_v36  ;;  %v2166_v62 = vadd.f32 %v2165_v2, %v2069_v39  ;;  %v2646_v54 = vpop.f32.mrb[76].mxu1 }
 0x390   : > { %v2647_v44 = vpop.f32.mrb[77].mxu1 }
 0x391   : > { %v3111_v46 = vpop.eup %3110  ;;  %3116 = vtanh.f32 %v2166_v62  ;;  %v2648_v45 = vadd.f32 %v2647_v44, %v2646_v54  ;;  %v2649_v47 = vpop.f32.mrb[78].mxu1 }
 0x392   : > { %v2227_v48 = vmul.f32 2.0, %v3111_v46  ;;  %v2650_v51 = vpop.f32.mrb[79].mxu1 }
 0x393   : > { %v3113_v58 = vpop.eup %3112  ;;  %v2074_v38 = vadd.f32 %v2648_v45, %v3892_v32  ;;  %v2651_v13 = vadd.f32 %v2650_v51, %v2649_v47 }
 0x394   : > { %2243 = vst [vmem:[%s3901_s29 + $0x10] sm:$0xff] %v2227_v48  ;;  %v2228_v37 = vmul.f32 2.0, %v3113_v58 }
 0x395   : > { %v2171_v29 = vadd.f32 %v2778_v9, %v2074_v38  ;;  %v2077_v40 = vadd.f32 %v2651_v13, %v3892_v32 }
 0x396   : > { %2244 = vst [vmem:[%s3901_s29 + $0x18] sm:$0xff] %v2228_v37 }
 0x397   : > { %3118 = vtanh.f32 %v2171_v29  ;;  %v2174_v53 = vadd.f32 %v2779_v61, %v2077_v40  ;;  %v2652_v55 = vpop.f32.mrb[80].mxu1 }
 0x398   : > { %v2653_v50 = vpop.f32.mrb[81].mxu1 }
 0x399   : > { %v3115_v17 = vpop.eup %3114  ;;  %3120 = vtanh.f32 %v2174_v53  ;;  %v2654_v57 = vadd.f32 %v2653_v50, %v2652_v55  ;;  %v2655_v5 = vpop.f32.mrb[82].mxu1 }
 0x39a   : > { %v2229_v59 = vmul.f32 2.0, %v3115_v17  ;;  %v2656_v60 = vpop.f32.mrb[83].mxu1 }
 0x39b   : > { %v3117_v31 = vpop.eup %3116  ;;  %v2657_v34 = vadd.f32 %v2656_v60, %v2655_v5  ;;  %v2082_v20 = vadd.f32 %v2654_v57, %v3892_v32 }
 0x39c   : > { %2245 = vst [vmem:[%s3901_s29 + $0x20] sm:$0xff] %v2229_v59  ;;  %v2230_v63 = vmul.f32 2.0, %v3117_v31 }
 0x39d   : > { %v2085_v22 = vadd.f32 %v2657_v34, %v3892_v32 }
 0x39e   : > { %2246 = vst [vmem:[%s3901_s29 + $0x28] sm:$0xff] %v2230_v63 }
 0x39f   : > { %v2658_v4 = vpop.f32.mrb[84].mxu1 }
 0x3a0   : > { %v2659_v15 = vpop.f32.mrb[85].mxu1 }
 0x3a1   : > { %v3119_v56 = vpop.eup %3118  ;;  %v2660_v6 = vadd.f32 %v2659_v15, %v2658_v4  ;;  %v2661_v42 = vpop.f32.mrb[86].mxu1 }
 0x3a2   : > { %v2231_v35 = vmul.f32 2.0, %v3119_v56  ;;  %v2662_v27 = vpop.f32.mrb[87].mxu1 }
 0x3a3   : > { %v3121_v7 = vpop.eup %3120  ;;  %v2663_v1 = vadd.f32 %v2662_v27, %v2661_v42  ;;  %v2090_v16 = vadd.f32 %v2660_v6, %v3892_v32 }
 0x3a4   : > { %2247 = vst [vmem:[%s3901_s29 + $0x30] sm:$0xff] %v2231_v35  ;;  %v2232_v30 = vmul.f32 2.0, %v3121_v7 }
 0x3a5   : > { %v2093_v23 = vadd.f32 %v2663_v1, %v3892_v32 }
 0x3a6   : > { %2248 = vst [vmem:[%s3901_s29 + $0x38] sm:$0xff] %v2232_v30 }
 0x3a7   : > { %v2664_v43 = vpop.f32.mrb[88].mxu1 }
 0x3a8   : > { %v2665_v8 = vpop.f32.mrb[89].mxu1 }
 0x3a9   : > { %v2666_v9 = vadd.f32 %v2665_v8, %v2664_v43  ;;  %v2667_v41 = vpop.f32.mrb[90].mxu1 }
 0x3aa   : > { %v2668_v19 = vpop.f32.mrb[91].mxu1 }
 0x3ab   : > { %v2669_v49 = vadd.f32 %v2668_v19, %v2667_v41  ;;  %v2098_v0 = vadd.f32 %v2666_v9, %v3892_v32 }
 0x3ad   : > { %v2101_v61 = vadd.f32 %v2669_v49, %v3892_v32 }
 0x3af   : > { %v2670_v25 = vpop.f32.mrb[92].mxu1 }
 0x3b0   : > { %v2671_v2 = vpop.f32.mrb[93].mxu1 }
 0x3b1   : > { %v2672_v33 = vadd.f32 %v2671_v2, %v2670_v25  ;;  %v2673_v52 = vpop.f32.mrb[94].mxu1 }
 0x3b2   : > { %v2674_v11 = vpop.f32.mrb[95].mxu1 }
 0x3b3   : > { %v2675_v21 = vadd.f32 %v2674_v11, %v2673_v52  ;;  %v2106_v12 = vadd.f32 %v2672_v33, %v3892_v32 }
 0x3b5   : > { %v2109_v14 = vadd.f32 %v2675_v21, %v3892_v32 }
 0x3b7   : > { %v2782_v18 = vpop.f32.mrb[96].mxu1 }
 0x3b8   : > { %v2187_v3 = vadd.f32 %v2782_v18, %v2090_v16  ;;  %v2178_v10 = vpop.f32.mrb[97].mxu1 }
 0x3b9   : > { %v2179_v26 = vadd.f32 %v2178_v10, %v2082_v20  ;;  %v2783_v24 = vpop.f32.mrb[98].mxu1 }
 0x3ba   : > { %3122 = vtanh.f32 %v2187_v3  ;;  %v2190_v28 = vadd.f32 %v2783_v24, %v2093_v23  ;;  %v2181_v36 = vpop.f32.mrb[99].mxu1 }
 0x3bb   : > { %3124 = vtanh.f32 %v2179_v26  ;;  %v2182_v39 = vadd.f32 %v2181_v36, %v2085_v22 }
 0x3bc   : > { %3126 = vtanh.f32 %v2190_v28 }
 0x3bd   : > { %3128 = vtanh.f32 %v2182_v39 }
 0x3bf   : > { %v2786_v62 = vpop.f32.mrb[100].mxu1 }
 0x3c0   : > { %v2203_v54 = vadd.f32 %v2786_v62, %v2106_v12  ;;  %v2194_v44 = vpop.f32.mrb[101].mxu1 }
 0x3c1   : > { %v2195_v46 = vadd.f32 %v2194_v44, %v2098_v0  ;;  %v2787_v45 = vpop.f32.mrb[102].mxu1 }
 0x3c2   : > { %3130 = vtanh.f32 %v2203_v54  ;;  %v2206_v47 = vadd.f32 %v2787_v45, %v2109_v14  ;;  %v2197_v48 = vpop.f32.mrb[103].mxu1 }
 0x3c3   : > { %3132 = vtanh.f32 %v2195_v46  ;;  %v2198_v32 = vadd.f32 %v2197_v48, %v2101_v61 }
 0x3c4   : > { %v3123_v51 = vpop.eup %3122  ;;  %3134 = vtanh.f32 %v2206_v47 }
 0x3c5   : > { %v3125_v58 = vpop.eup %3124  ;;  %v2235_v38 = vmul.f32 2.0, %v3123_v51  ;;  %3136 = vtanh.f32 %v2198_v32 }
 0x3c6   : > { %v3127_v13 = vpop.eup %3126  ;;  %v2233_v37 = vmul.f32 2.0, %v3125_v58 }
 0x3c7   : > { %v3129_v29 = vpop.eup %3128  ;;  %2251 = vst [vmem:[%s3901_s29 + $0x50] sm:$0xff] %v2235_v38  ;;  %v2236_v40 = vmul.f32 2.0, %v3127_v13 }
 0x3c8   : > { %2249 = vst [vmem:[%s3901_s29 + $0x40] sm:$0xff] %v2233_v37  ;;  %v2234_v53 = vmul.f32 2.0, %v3129_v29 }
 0x3c9   : > { %2252 = vst [vmem:[%s3901_s29 + $0x58] sm:$0xff] %v2236_v40 }
 0x3ca   : > { %2250 = vst [vmem:[%s3901_s29 + $0x48] sm:$0xff] %v2234_v53 }
 0x3cc   : > { %v3131_v55 = vpop.eup %3130 }
 0x3cd   : > { %v3133_v50 = vpop.eup %3132  ;;  %v2239_v17 = vmul.f32 2.0, %v3131_v55 }
 0x3ce   : > { %v3135_v57 = vpop.eup %3134  ;;  %v2237_v5 = vmul.f32 2.0, %v3133_v50 }
 0x3cf   : > { %v3137_v59 = vpop.eup %3136  ;;  %2255 = vst [vmem:[%s3901_s29 + $0x70] sm:$0xff] %v2239_v17  ;;  %v2240_v60 = vmul.f32 2.0, %v3135_v57 }
 0x3d0   : > { %2253 = vst [vmem:[%s3901_s29 + $0x60] sm:$0xff] %v2237_v5  ;;  %v2238_v31 = vmul.f32 2.0, %v3137_v59 }
 0x3d1   : > { %2256 = vst [vmem:[%s3901_s29 + $0x78] sm:$0xff] %v2240_v60 }
 0x3d2   : > { %2254 = vst [vmem:[%s3901_s29 + $0x68] sm:$0xff] %v2238_v31 }
 0x3d3   : > { %3265 = shalt.err (!%p3262_p4)
}
 0x3d4   : > { %s3266_s10 = scalar_lea.hbm %s3932_s16, 2048  ;;  %s3270_s13 = scalar_lea.hbm %s3988_s7, 4096 }
 0x3d5   : > { %p3267_p9 = scmp.ne.s32.totalorder %s3932_s16, %s3266_s10  ;;  %p3271_p8 = scmp.lt.u32.totalorder %s3932_s16, %s3988_s7 }
 0x3d6   : > { %p3272_p13 = scmp.lt.u32.totalorder %s3270_s13, %s3266_s10  ;;  %p3274_p10 = scmp.lt.u32.totalorder %s3266_s10, %s3932_s16 }
 0x3d7   : > { %p3268_p0 = pnand %p3267_p9, %p3527_p5 }
 0x3d8   : > { %p3273_p6 = por %p3272_p13, %p3271_p8 }
 0x3d9   : > { %p3269_p11 = pneg %p3268_p0 }
 0x3da   : > { %p3275_p3 = por %p3274_p10, %p3273_p6 }
 0x3dc   : > { %p3276_p7 = pnand %p3275_p3, %p3269_p11 }
 0x3de   : > { %3279 = shalt.err (!%p3276_p7)
}
 0x3df   : > { %s3340_s15 = smov 128   ;;  %s3341_s18 = smov 8  }
 0x3e0   : > { %2882 = dma.vmem_to_hbm [thread:$0]  (%p3527_p5), %s3934_s17, 2048, %s3932_s16, %s2258_s28, %s3340_s15, %s3340_s15, %s3341_s18  }
 0x3e1 PF: > { %s4008_s23 = sld [smem:[#allocation15_spill]]  ;;  %s2286_s12 = sand.u32 1, %s3314_s24  }
 0x3e2   : > { %p4010_p2 = scmp.ge.s32.totalorder %s3326_s27, 2  ;;  %s2287_s30 = scalar_lea.sflag [#allocation4], %s2286_s12 }
 0x3e7   : > { %p4009_p12 = scmp.ne.s32.totalorder %s4008_s23, 0 }
 0x3e9   : > { %p2899_p1 = pnand %p4010_p2, %p4009_p12 }
 0x3eb   : > { %3309 = dma.done.wait (!%p2899_p1), %s2287_s30, 2048  }
 0x3ec   : > { %3311 = vsyncadd (!%p2899_p1), %s2287_s30, 4294965248  ;;  %p22_p4 = scmp.ge.s32.totalorder %s3513_s8, 4   ;;  %s4011_s24 = smov %s3318_s25 }
 0x3ed   : > { %s4012_s25 = smov %s3322_s26  ;;  %s4013_s26 = smov %s3523_s19 }
 0x3ee   : > { %s4014_s27 = smov %s3513_s8  ;;  %24 = sbr.rel (!%p22_p4) target bundleno = 7 (0x7), region = 105 }
 0x3f5   :  { %2292 = vsyncpa [#allocation3], 1 }
 0x3f6   :  { %2294 = vsyncpa [#allocation3 + $0x1], 1 }
 0x3f7   :  { %2295 = vsyncpa [#allocation6], 1 }
 0x3f8   :  { %2296 = vsyncpa [#allocation9], 1 }
 0x3f9   :  { %2297 = vsyncpa [#allocation4], 1 }
 0x3fa   :  { %2299 = vsyncpa [#allocation4 + $0x1], 1 }

</bundles_post_ra>
